<compile_context>
chip_gen: v7x
topology: tpu7x:2x2x1
jax: 0.10.0
libtpu: 0.0.40
codegen_flags: <defaults>
</compile_context>

<pallas_src>
import functools

import jax
import jax.numpy as jnp
from jax import lax
from jax.experimental import pallas as pl
from jax.experimental.pallas import tpu as pltpu

LANE = 128


def _round_up(x, m):
    return (x + m - 1) // m * m


def _fold_bn(gamma, beta, mean, var, conv_bias=None, eps=1e-5):
    scale = gamma / jnp.sqrt(var + eps)
    bias = beta - mean * scale
    if conv_bias is not None:
        bias = bias + conv_bias * scale
    return scale, bias


@functools.lru_cache(maxsize=None)
def _vmem_limit_bytes():
    try:
        cap = int(pltpu.get_tpu_info().vmem_capacity_bytes)
    except Exception:
        cap = 64 << 20          # be conservative (v7x-sized) if query fails
    return int(min(cap * 3 // 4, 100 << 20))


# ----------------------------- fused Pallas kernel -------------------------- #

def _convblock_kernel(*refs, b_tile, ho, wo, wc, c1p, shortcut_mode):
    """Fused ConvBlock for one batch tile.

    refs = (x1, w1, b1, w2, b2, [xs], out, h1p_scratch)
      x1  : (b_tile, ho*wc, 9*cin)      bf16  im2col of the block input (conv1)
      w1  : (9*cin, c1p)                bf16  BN1-folded conv1 weights
      b1  : (1, c1p)                    f32   folded BN1 bias
      w2  : (9*c1p [+128], c1p)         bf16  BN2-folded conv2 weights
                                              (+ projection-shortcut rows)
      b2  : (1, c1p)                    f32   folded BN2 (+ shortcut BN) bias
      xs  : (b_tile, ho*wc, 128|c1p)    f32   shortcut input (project / identity)
      out : (b_tile, ho*wc, c1p)        f32
      h1p : (b_tile, ho+2, wc+2, c1p)   f32   VMEM scratch: padded intermediate
    """
    if shortcut_mode == "none":
        x1_ref, w1_ref, b1_ref, w2_ref, b2_ref, o_ref, h1p_ref = refs
        xs_ref = None
    else:
        x1_ref, w1_ref, b1_ref, w2_ref, b2_ref, xs_ref, o_ref, h1p_ref = refs

    m = b_tile * ho * wc

    # ---- conv1 + bn1 + relu : one MXU contraction, K = 9*cin ----------------
    x1 = x1_ref[...].reshape(m, x1_ref.shape[-1])
    h1 = jnp.dot(x1, w1_ref[...], preferred_element_type=jnp.float32)
    h1 = jnp.maximum(h1 + b1_ref[...], 0.0)
    h1 = h1.reshape(b_tile, ho, wc, c1p)

    # Padded compute columns must be exactly zero before conv2 reads them.
    if wc > wo:
        col = lax.broadcasted_iota(jnp.int32, (b_tile, ho, wc, c1p), 2)
        h1 = jnp.where(col < wo, h1, 0.0)

    # ---- stage intermediate with its zero halo in VMEM ----------------------
    h1p_ref[...] = jnp.zeros(h1p_ref.shape, h1p_ref.dtype)
    h1p_ref[:, 1:1 + ho, 1:1 + wc, :] = h1

    # ---- conv2 + bn2 (+ projection shortcut): in-VMEM im2col, one contraction
    taps = [h1p_ref[:, kh:kh + ho, kw:kw + wc, :]
            for kh in range(3) for kw in range(3)]
    if shortcut_mode == "project":
        taps.append(xs_ref[...].reshape(b_tile, ho, wc, xs_ref.shape[-1]))
    cols = jnp.concatenate(taps, axis=-1)                       # (b, ho, wc, K2)
    cols = cols.reshape(m, cols.shape[-1]).astype(jnp.bfloat16)

    acc = jnp.dot(cols, w2_ref[...], preferred_element_type=jnp.float32)
    acc = acc + b2_ref[...]

    if shortcut_mode == "identity":
        acc = acc + xs_ref[...].reshape(m, acc.shape[-1])        # plain f32 add

    o_ref[...] = acc.reshape(o_ref.shape).astype(o_ref.dtype)


# --------------------------------- wrapper ---------------------------------- #

def convblock_forward(x_nchw, params, *, in_channels, out_channels, stride,
                      residual_connection):
    x = jnp.transpose(x_nchw, (0, 2, 3, 1)).astype(jnp.float32)      # NHWC
    n, h, w, cin = x.shape
    cout = out_channels
    s = int(stride)
    ho = (h - 1) // s + 1
    wo = (w - 1) // s + 1
    wc = _round_up(wo, 8)                 # sublane-aligned compute width
    c1p = _round_up(cout, LANE)           # lane-dense channels (conv1 out / conv2 in+out)
    m_img = ho * wc

    # Fold the batch into the MXU M dim: target >=256 rows, cap the f32
    # accumulator (M * c1p * 4B) at ~128 KiB.
    b_tile = max(1, min(n, max(1, 256 // m_img)))
    n_pad = _round_up(n, b_tile)

    # ---- fold BN into weights / biases -------------------------------------
    s1, b1 = _fold_bn(params["bn1_gamma"], params["bn1_beta"],
                      params["bn1_mean"], params["bn1_var"], params["b1"])
    s2, b2 = _fold_bn(params["bn2_gamma"], params["bn2_beta"],
                      params["bn2_mean"], params["bn2_var"], params["b2"])

    w1k = params["w1"].astype(jnp.float32) * s1.reshape(1, 1, 1, cout)
    w1k = w1k.reshape(9 * cin, cout)                                  # (kh,kw,cin) major
    w1k = jnp.pad(w1k, ((0, 0), (0, c1p - cout))).astype(jnp.bfloat16)
    b1k = jnp.pad(b1, (0, c1p - cout)).reshape(1, c1p).astype(jnp.float32)

    w2k = params["w2"].astype(jnp.float32) * s2.reshape(1, 1, 1, cout)
    w2k = jnp.pad(w2k, ((0, 0), (0, 0), (0, c1p - cout), (0, c1p - cout)))
    w2k = w2k.reshape(9 * c1p, c1p)                                   # f32 for now
    b2k = jnp.pad(b2, (0, c1p - cout)).reshape(1, c1p).astype(jnp.float32)

    # ---- conv1 im2col in XLA: lane-dense K = 9*cin (tiny data, done once) ---
    xpad = jnp.pad(x, ((0, 0), (1, 1), (1, 1), (0, 0)))
    taps1 = []
    for kh in range(3):
        for kw in range(3):
            t = lax.slice(xpad, (0, kh, kw, 0),
                          (n, kh + (ho - 1) * s + 1, kw + (wo - 1) * s + 1, cin),
                          (1, s, s, 1))                               # (n, ho, wo, cin)
            taps1.append(t)
    x1 = jnp.concatenate(taps1, axis=-1)                              # (n, ho, wo, 9*cin)
    x1 = jnp.pad(x1, ((0, n_pad - n), (0, 0), (0, wc - wo), (0, 0)))
    x1 = x1.reshape(n_pad, m_img, 9 * cin).astype(jnp.bfloat16)

    # ---- shortcut ------------------------------------------------------------
    shortcut_mode = "none"
    xs = None
    if residual_connection:
        if in_channels != out_channels or s != 1:
            shortcut_mode = "project"   # fuse 1x1 conv + BN into the conv2 dot
            ssc, bsc = _fold_bn(params["bnsc_gamma"], params["bnsc_beta"],
                                params["bnsc_mean"], params["bnsc_var"], None)
            wsc = params["wsc"].reshape(cin, cout).astype(jnp.float32) * ssc
            csp = LANE
            wsc = jnp.pad(wsc, ((0, csp - cin), (0, c1p - cout)))
            w2k = jnp.concatenate([w2k, wsc], axis=0)                 # (9*c1p+128, c1p)
            b2k = b2k + jnp.pad(bsc, (0, c1p - cout)).reshape(1, c1p)
            xs = x[:, ::s, ::s, :][:, :ho, :wo, :]
            xs = jnp.pad(xs, ((0, n_pad - n), (0, 0), (0, wc - wo), (0, csp - cin)))
            xs = xs.reshape(n_pad, m_img, csp).astype(jnp.float32)
        else:
            shortcut_mode = "identity"  # plain f32 add in the epilogue
            xs = jnp.pad(x, ((0, n_pad - n), (0, 0), (0, wc - wo), (0, c1p - cin)))
            xs = xs.reshape(n_pad, m_img, c1p).astype(jnp.float32)
    w2k = w2k.astype(jnp.bfloat16)

    k1 = 9 * cin
    k2 = w2k.shape[0]
    grid = (n_pad // b_tile,)

    in_specs = [
        pl.BlockSpec((b_tile, m_img, k1), lambda i: (i, 0, 0)),
        pl.BlockSpec((k1, c1p), lambda i: (0, 0)),
        pl.BlockSpec((1, c1p), lambda i: (0, 0)),
        pl.BlockSpec((k2, c1p), lambda i: (0, 0)),
        pl.BlockSpec((1, c1p), lambda i: (0, 0)),
    ]
    args = [x1, w1k, b1k, w2k, b2k]
    if shortcut_mode != "none":
        in_specs.append(pl.BlockSpec((b_tile, m_img, xs.shape[-1]),
                                     lambda i: (i, 0, 0)))
        args.append(xs)

    kernel = functools.partial(_convblock_kernel, b_tile=b_tile, ho=ho, wo=wo,
                               wc=wc, c1p=c1p, shortcut_mode=shortcut_mode)

    m_total = n_pad * m_img
    flops = 2 * m_total * (k1 * c1p + k2 * c1p)
    bytes_acc = (x1.size * 2 + w1k.size * 2 + b1k.size * 4 + w2k.size * 2
                 + b2k.size * 4 + (xs.size * 4 if xs is not None else 0)
                 + m_total * c1p * 4)

    out = pl.pallas_call(
        kernel,
        out_shape=jax.ShapeDtypeStruct((n_pad, m_img, c1p), jnp.float32),
        grid_spec=pltpu.PrefetchScalarGridSpec(
            num_scalar_prefetch=0,
            grid=grid,
            in_specs=in_specs,
            out_specs=pl.BlockSpec((b_tile, m_img, c1p), lambda i: (i, 0, 0)),
            scratch_shapes=[pltpu.VMEM((b_tile, ho + 2, wc + 2, c1p), jnp.float32)],
        ),
        compiler_params=pltpu.CompilerParams(
            dimension_semantics=("parallel",),
            vmem_limit_bytes=_vmem_limit_bytes(),
        ),
        cost_estimate=pl.CostEstimate(flops=int(flops), transcendentals=0,
                                      bytes_accessed=int(bytes_acc)),
    )(*args)

    out = out.reshape(n_pad, ho, wc, c1p)[:n, :, :wo, :cout]
    return jnp.transpose(out, (0, 3, 1, 2))           # back to NCHW


# --------------------------- reference (pure JAX) --------------------------- #

def _ref_conv(x, w_hwio, b, stride, pad):
    w_oihw = jnp.transpose(w_hwio, (3, 2, 0, 1))
    y = lax.conv_general_dilated(x, w_oihw, (stride, stride),
                                 [(pad, pad), (pad, pad)],
                                 dimension_numbers=("NCHW", "OIHW", "NCHW"))
    if b is not None:
        y = y + b.reshape(1, -1, 1, 1)
    return y


def _ref_bn(x, gamma, beta, mean, var, eps=1e-5):
    sh = (1, -1, 1, 1)
    return (x - mean.reshape(sh)) / jnp.sqrt(var.reshape(sh) + eps) \
        * gamma.reshape(sh) + beta.reshape(sh)


def ref_forward(x, params, *, in_channels, out_channels, stride, residual_connection):
    out = _ref_conv(x, params["w1"], params["b1"], stride, 1)
    out = _ref_bn(out, params["bn1_gamma"], params["bn1_beta"],
                  params["bn1_mean"], params["bn1_var"])
    out = jnp.maximum(out, 0.0)
    out = _ref_conv(out, params["w2"], params["b2"], 1, 1)
    out = _ref_bn(out, params["bn2_gamma"], params["bn2_beta"],
                  params["bn2_mean"], params["bn2_var"])
    if residual_connection:
        if in_channels != out_channels or stride != 1:
            sc = _ref_conv(x, params["wsc"], None, stride, 0)
            sc = _ref_bn(sc, params["bnsc_gamma"], params["bnsc_beta"],
                         params["bnsc_mean"], params["bnsc_var"])
        else:
            sc = x
        out = out + sc
    return out


# --------------------------------- main ------------------------------------ #

def init_params(key, cin, cout):
    ks = jax.random.split(key, 16)
    return {
        "w1": 0.1 * jax.random.normal(ks[0], (3, 3, cin, cout), jnp.float32),
        "b1": 0.1 * jax.random.normal(ks[1], (cout,), jnp.float32),
        "bn1_gamma": jax.random.uniform(ks[2], (cout,), jnp.float32, 0.5, 1.5),
        "bn1_beta": 0.1 * jax.random.normal(ks[3], (cout,), jnp.float32),
        "bn1_mean": 0.1 * jax.random.normal(ks[4], (cout,), jnp.float32),
        "bn1_var": jax.random.uniform(ks[5], (cout,), jnp.float32, 0.5, 1.5),
        "w2": 0.1 * jax.random.normal(ks[6], (3, 3, cout, cout), jnp.float32),
        "b2": 0.1 * jax.random.normal(ks[7], (cout,), jnp.float32),
        "bn2_gamma": jax.random.uniform(ks[8], (cout,), jnp.float32, 0.5, 1.5),
        "bn2_beta": 0.1 * jax.random.normal(ks[9], (cout,), jnp.float32),
        "bn2_mean": 0.1 * jax.random.normal(ks[10], (cout,), jnp.float32),
        "bn2_var": jax.random.uniform(ks[11], (cout,), jnp.float32, 0.5, 1.5),
        # 1x1 shortcut conv (bias=False) + its BN
        "wsc": 0.1 * jax.random.normal(ks[12], (1, 1, cin, cout), jnp.float32),
        "bnsc_gamma": jax.random.uniform(ks[13], (cout,), jnp.float32, 0.5, 1.5),
        "bnsc_beta": 0.1 * jax.random.normal(ks[14], (cout,), jnp.float32),
        "bnsc_mean": jnp.zeros((cout,), jnp.float32),
        "bnsc_var": jax.random.uniform(ks[15], (cout,), jnp.float32, 0.5, 1.5),
    }


if __name__ == "__main__":
    key = jax.random.PRNGKey(0)
    configs = [
        # (cin, cout, stride, residual, H, W)
        (4, 8, 2, True, 16, 16),    # projection shortcut (the spec's main case)
        (8, 8, 1, True, 16, 16),    # identity shortcut (fused f32 epilogue add)
        (4, 8, 1, False, 15, 15),   # no residual; wo % 8 != 0 exercises masking
    ]
    for idx, (cin, cout, s, res, H, W) in enumerate(configs):
        kx, kp, key = jax.random.split(key, 3)
        x = jax.random.normal(kx, (2, cin, H, W), jnp.float32)   # NCHW
        params = init_params(kp, cin, cout)

        fwd = jax.jit(functools.partial(
            convblock_forward, in_channels=cin, out_channels=cout,
            stride=s, residual_connection=res))
        out = jax.block_until_ready(fwd(x, params))

        ref = ref_forward(x, params, in_channels=cin, out_channels=cout,
                          stride=s, residual_connection=res)
        assert out.shape == ref.shape, (out.shape, ref.shape)
        max_err = jnp.max(jnp.abs(out - ref))
        # bf16 MXU operands -> bf16-appropriate tolerance
        assert jnp.allclose(out, ref, rtol=5e-2, atol=8e-2), \
            f"config {idx}: max err {max_err}"

    print("KERNEL_OK")
</pallas_src>

<mosaic_0001>
module attributes {stable_mosaic.version = 11 : i64} {
  func.func @_convblock_kernel(%arg0: i32, %arg1: memref<2x64x36xbf16, #tpu.memory_space<vmem>>, %arg2: memref<36x128xbf16, #tpu.memory_space<vmem>>, %arg3: memref<1x128xf32, #tpu.memory_space<vmem>>, %arg4: memref<1280x128xbf16, #tpu.memory_space<vmem>>, %arg5: memref<1x128xf32, #tpu.memory_space<vmem>>, %arg6: memref<2x64x128xf32, #tpu.memory_space<vmem>>, %arg7: memref<2x64x128xf32, #tpu.memory_space<vmem>>, %arg8: memref<2x10x10x128xf32, #tpu.memory_space<vmem>>) attributes {dimension_semantics = [#tpu.dimension_semantics<parallel>], iteration_bounds = array<i64: 1>, scalar_prefetch = 0 : i64, scratch_operands = 1 : i64, tpu.core_type = #tpu.core_type<tc>, window_params = [{transform_indices = @transform_0, window_bounds = array<i64: 2, 64, 36>}, {pipeline_mode = #tpu.pipeline_mode<synchronous>, transform_indices = @transform_1, window_bounds = array<i64: 36, 128>}, {pipeline_mode = #tpu.pipeline_mode<synchronous>, transform_indices = @transform_2, window_bounds = array<i64: 1, 128>}, {pipeline_mode = #tpu.pipeline_mode<synchronous>, transform_indices = @transform_3, window_bounds = array<i64: 1280, 128>}, {pipeline_mode = #tpu.pipeline_mode<synchronous>, transform_indices = @transform_4, window_bounds = array<i64: 1, 128>}, {transform_indices = @transform_5, window_bounds = array<i64: 2, 64, 128>}, {transform_indices = @transform_6, window_bounds = array<i64: 2, 64, 128>}]} {
    %c0 = arith.constant 0 : index
    %c0_0 = arith.constant 0 : index
    %c0_1 = arith.constant 0 : index
    %0 = vector.load %arg1[%c0, %c0_0, %c0_1] : memref<2x64x36xbf16, #tpu.memory_space<vmem>>, vector<2x64x36xbf16>
    %1 = vector.shape_cast %0 : vector<2x64x36xbf16> to vector<128x36xbf16>
    %c0_2 = arith.constant 0 : index
    %c0_3 = arith.constant 0 : index
    %2 = vector.load %arg2[%c0_2, %c0_3] : memref<36x128xbf16, #tpu.memory_space<vmem>>, vector<36x128xbf16>
    %cst = arith.constant dense<0.000000e+00> : vector<128x128xf32>
    %3 = tpu.matmul %1, %2, %cst {dimension_numbers = #tpu.dot_dimension_numbers<[1], [0], [0], [1], [0, 0, 1, 1], [], []>} : vector<128x36xbf16>, vector<36x128xbf16>, vector<128x128xf32> -> vector<128x128xf32>
    %c0_4 = arith.constant 0 : index
    %c0_5 = arith.constant 0 : index
    %4 = vector.load %arg3[%c0_4, %c0_5] : memref<1x128xf32, #tpu.memory_space<vmem>>, vector<1x128xf32>
    %5 = vector.broadcast %4 : vector<1x128xf32> to vector<128x128xf32>
    %6 = arith.addf %3, %5 : vector<128x128xf32>
    %cst_6 = arith.constant 0.000000e+00 : f32
    %7 = vector.broadcast %cst_6 : f32 to vector<128x128xf32>
    %8 = arith.maximumf %6, %7 : vector<128x128xf32>
    %9 = vector.shape_cast %8 : vector<128x128xf32> to vector<2x8x8x128xf32>
    %cst_7 = arith.constant 0.000000e+00 : f32
    %10 = vector.broadcast %cst_7 : f32 to vector<2x10x10x128xf32>
    %c0_8 = arith.constant 0 : index
    %c0_9 = arith.constant 0 : index
    %c0_10 = arith.constant 0 : index
    %c0_11 = arith.constant 0 : index
    %11 = vector.load %arg8[%c0_8, %c0_9, %c0_10, %c0_11] : memref<2x10x10x128xf32, #tpu.memory_space<vmem>>, vector<2x10x10x128xf32>
    tpu.vector_store %arg8[%c0_8, %c0_9, %c0_10, %c0_11], %10 {strides = array<i32>} : memref<2x10x10x128xf32, #tpu.memory_space<vmem>>, vector<2x10x10x128xf32>,
    %c0_12 = arith.constant 0 : index
    %c1 = arith.constant 1 : index
    %c1_13 = arith.constant 1 : index
    %c0_14 = arith.constant 0 : index
    %12 = vector.load %arg8[%c0_12, %c1, %c1_13, %c0_14] : memref<2x10x10x128xf32, #tpu.memory_space<vmem>>, vector<2x8x8x128xf32>
    tpu.vector_store %arg8[%c0_12, %c1, %c1_13, %c0_14], %9 {strides = array<i32>} : memref<2x10x10x128xf32, #tpu.memory_space<vmem>>, vector<2x8x8x128xf32>,
    %c0_15 = arith.constant 0 : index
    %c0_16 = arith.constant 0 : index
    %c0_17 = arith.constant 0 : index
    %c0_18 = arith.constant 0 : index
    %13 = vector.load %arg8[%c0_15, %c0_16, %c0_17, %c0_18] : memref<2x10x10x128xf32, #tpu.memory_space<vmem>>, vector<2x8x8x128xf32>
    %c0_19 = arith.constant 0 : index
    %c0_20 = arith.constant 0 : index
    %c1_21 = arith.constant 1 : index
    %c0_22 = arith.constant 0 : index
    %14 = vector.load %arg8[%c0_19, %c0_20, %c1_21, %c0_22] : memref<2x10x10x128xf32, #tpu.memory_space<vmem>>, vector<2x8x8x128xf32>
    %c0_23 = arith.constant 0 : index
    %c0_24 = arith.constant 0 : index
    %c2 = arith.constant 2 : index
    %c0_25 = arith.constant 0 : index
    %15 = vector.load %arg8[%c0_23, %c0_24, %c2, %c0_25] : memref<2x10x10x128xf32, #tpu.memory_space<vmem>>, vector<2x8x8x128xf32>
    %c0_26 = arith.constant 0 : index
    %c1_27 = arith.constant 1 : index
    %c0_28 = arith.constant 0 : index
    %c0_29 = arith.constant 0 : index
    %16 = vector.load %arg8[%c0_26, %c1_27, %c0_28, %c0_29] : memref<2x10x10x128xf32, #tpu.memory_space<vmem>>, vector<2x8x8x128xf32>
    %c0_30 = arith.constant 0 : index
    %c1_31 = arith.constant 1 : index
    %c1_32 = arith.constant 1 : index
    %c0_33 = arith.constant 0 : index
    %17 = vector.load %arg8[%c0_30, %c1_31, %c1_32, %c0_33] : memref<2x10x10x128xf32, #tpu.memory_space<vmem>>, vector<2x8x8x128xf32>
    %c0_34 = arith.constant 0 : index
    %c1_35 = arith.constant 1 : index
    %c2_36 = arith.constant 2 : index
    %c0_37 = arith.constant 0 : index
    %18 = vector.load %arg8[%c0_34, %c1_35, %c2_36, %c0_37] : memref<2x10x10x128xf32, #tpu.memory_space<vmem>>, vector<2x8x8x128xf32>
    %c0_38 = arith.constant 0 : index
    %c2_39 = arith.constant 2 : index
    %c0_40 = arith.constant 0 : index
    %c0_41 = arith.constant 0 : index
    %19 = vector.load %arg8[%c0_38, %c2_39, %c0_40, %c0_41] : memref<2x10x10x128xf32, #tpu.memory_space<vmem>>, vector<2x8x8x128xf32>
    %c0_42 = arith.constant 0 : index
    %c2_43 = arith.constant 2 : index
    %c1_44 = arith.constant 1 : index
    %c0_45 = arith.constant 0 : index
    %20 = vector.load %arg8[%c0_42, %c2_43, %c1_44, %c0_45] : memref<2x10x10x128xf32, #tpu.memory_space<vmem>>, vector<2x8x8x128xf32>
    %c0_46 = arith.constant 0 : index
    %c2_47 = arith.constant 2 : index
    %c2_48 = arith.constant 2 : index
    %c0_49 = arith.constant 0 : index
    %21 = vector.load %arg8[%c0_46, %c2_47, %c2_48, %c0_49] : memref<2x10x10x128xf32, #tpu.memory_space<vmem>>, vector<2x8x8x128xf32>
    %c0_50 = arith.constant 0 : index
    %c0_51 = arith.constant 0 : index
    %c0_52 = arith.constant 0 : index
    %22 = vector.load %arg6[%c0_50, %c0_51, %c0_52] : memref<2x64x128xf32, #tpu.memory_space<vmem>>, vector<2x64x128xf32>
    %23 = vector.shape_cast %22 : vector<2x64x128xf32> to vector<2x8x8x128xf32>
    %24 = tpu.concatenate %13, %14, %15, %16, %17, %18, %19, %20, %21, %23 in 3 : vector<2x8x8x128xf32>, vector<2x8x8x128xf32>, vector<2x8x8x128xf32>, vector<2x8x8x128xf32>, vector<2x8x8x128xf32>, vector<2x8x8x128xf32>, vector<2x8x8x128xf32>, vector<2x8x8x128xf32>, vector<2x8x8x128xf32>, vector<2x8x8x128xf32> -> vector<2x8x8x1280xf32>
    %25 = vector.shape_cast %24 : vector<2x8x8x1280xf32> to vector<128x1280xf32>
    %26 = arith.truncf %25 : vector<128x1280xf32> to vector<128x1280xbf16>
    %c0_53 = arith.constant 0 : index
    %c0_54 = arith.constant 0 : index
    %27 = vector.load %arg4[%c0_53, %c0_54] : memref<1280x128xbf16, #tpu.memory_space<vmem>>, vector<1280x128xbf16>
    %cst_55 = arith.constant dense<0.000000e+00> : vector<128x128xf32>
    %28 = tpu.matmul %26, %27, %cst_55 {dimension_numbers = #tpu.dot_dimension_numbers<[1], [0], [0], [1], [0, 0, 1, 1], [], []>} : vector<128x1280xbf16>, vector<1280x128xbf16>, vector<128x128xf32> -> vector<128x128xf32>
    %c0_56 = arith.constant 0 : index
    %c0_57 = arith.constant 0 : index
    %29 = vector.load %arg5[%c0_56, %c0_57] : memref<1x128xf32, #tpu.memory_space<vmem>>, vector<1x128xf32>
    %30 = vector.broadcast %29 : vector<1x128xf32> to vector<128x128xf32>
    %31 = arith.addf %28, %30 : vector<128x128xf32>
    %32 = vector.shape_cast %31 : vector<128x128xf32> to vector<2x64x128xf32>
    %c0_58 = arith.constant 0 : index
    %c0_59 = arith.constant 0 : index
    %c0_60 = arith.constant 0 : index
    %33 = vector.load %arg7[%c0_58, %c0_59, %c0_60] : memref<2x64x128xf32, #tpu.memory_space<vmem>>, vector<2x64x128xf32>
    tpu.vector_store %arg7[%c0_58, %c0_59, %c0_60], %32 {strides = array<i32>} : memref<2x64x128xf32, #tpu.memory_space<vmem>>, vector<2x64x128xf32>,
    return
  }
  func.func @transform_0(%arg0: i32) -> (i32, i32, i32) {
    %c0_i32 = arith.constant 0 : i32
    %c0_i32_0 = arith.constant 0 : i32
    %c0_i32_1 = arith.constant 0 : i32
    return %arg0, %c0_i32, %c0_i32_0 : i32, i32, i32
  }
  func.func @transform_1(%arg0: i32) -> (i32, i32) {
    %c0_i32 = arith.constant 0 : i32
    %c0_i32_0 = arith.constant 0 : i32
    %c0_i32_1 = arith.constant 0 : i32
    return %c0_i32, %c0_i32_0 : i32, i32
  }
  func.func @transform_2(%arg0: i32) -> (i32, i32) {
    %c0_i32 = arith.constant 0 : i32
    %c0_i32_0 = arith.constant 0 : i32
    %c0_i32_1 = arith.constant 0 : i32
    return %c0_i32, %c0_i32_0 : i32, i32
  }
  func.func @transform_3(%arg0: i32) -> (i32, i32) {
    %c0_i32 = arith.constant 0 : i32
    %c0_i32_0 = arith.constant 0 : i32
    %c0_i32_1 = arith.constant 0 : i32
    return %c0_i32, %c0_i32_0 : i32, i32
  }
  func.func @transform_4(%arg0: i32) -> (i32, i32) {
    %c0_i32 = arith.constant 0 : i32
    %c0_i32_0 = arith.constant 0 : i32
    %c0_i32_1 = arith.constant 0 : i32
    return %c0_i32, %c0_i32_0 : i32, i32
  }
  func.func @transform_5(%arg0: i32) -> (i32, i32, i32) {
    %c0_i32 = arith.constant 0 : i32
    %c0_i32_0 = arith.constant 0 : i32
    %c0_i32_1 = arith.constant 0 : i32
    return %arg0, %c0_i32, %c0_i32_0 : i32, i32, i32
  }
  func.func @transform_6(%arg0: i32) -> (i32, i32, i32) {
    %c0_i32 = arith.constant 0 : i32
    %c0_i32_0 = arith.constant 0 : i32
    %c0_i32_1 = arith.constant 0 : i32
    return %arg0, %c0_i32, %c0_i32_0 : i32, i32, i32
  }
}

</mosaic_0001>

<bundles_post_ra>
// kernel: convblock_forward.1
= control target key start
LH: loop header
LB: loop body
LE: loop exit
PB: predicated region body
PF: predicated region fallthrough
CT: control target
= control target key end

     0   :  { %vm107_vm0 = vcmask 293888   ;;  %vm132_vm1 = vcmask 1041408   ;;  %v2262_v27 = vmov 0.0   ;;  %s3109_s1 = inlined_call_operand.vmem [shape: bf16[36,128], index: 1, kind: input, shape index: {}]   ;;  %s3110_s0 = inlined_call_operand.vmem [shape: bf16[2,64,36], index: 0, kind: input, shape index: {}]   ;;  %s3111_s3 = inlined_call_operand.vmem [shape: bf16[1280,128], index: 3, kind: input, shape index: {}]   ;;  %s3112_s2 = inlined_call_operand.vmem [shape: f32[1,128], index: 2, kind: input, shape index: {}]   ;;  %s3113_s5 = inlined_call_operand.vmem [shape: f32[2,64,128], index: 5, kind: input, shape index: {}]   ;;  %s3114_s4 = inlined_call_operand.vmem [shape: f32[1,128], index: 4, kind: input, shape index: {}]   ;;  %s3115_s6 = inlined_call_operand.vmem [shape: f32[2,64,128], index: 6, kind: output, shape index: {}]  }
   0x1   :  { %v2171_v0 = vld [vmem:[%s3109_s1] sm:$0xff]   ;;  %v2172_v1 = vld [vmem:[%s3109_s1 + $0x8] sm:$0xff]   ;;  %v2173_v2 = vld [vmem:[%s3109_s1 + $0x10] ss:$0 sps:$4 sm:$0x33]   ;;  %255 = vst [vmem:[#allocation2 + $0x30] sm:$0xff] %v2262_v27 }
   0x2   :  { %2131 = vmatprep.subr.bf16.mxu0 %v2171_v0  ;;  %v2174_v3 = vld [vmem:[%s3110_s0] sm:$0xff]   ;;  %v134_v4 = vsel %vm132_vm1, %v2173_v2, 0  ;;  %v2175_v5 = vld [vmem:[%s3110_s0 + $0x8] sm:$0xff]   ;;  %v2176_v6 = vld [vmem:[%s3110_s0 + $0x10] sm:$0xff]   ;;  %256 = vst [vmem:[#allocation2 + $0x38] sm:$0x3] %v2262_v27 }
   0x3   :  { %2132 = vmatpush3.bf16.msra.mxu0 %v2171_v0  ;;  %2137 = vmatprep.mubr.msk.bf16.mxu0 %vm107_vm0, %v2174_v3  ;;  %v2182_v7 = vld [vmem:[%s3111_s3 + $0x40] sm:$0xff]   ;;  %v2185_v10 = vld [vmem:[%s3111_s3 + $0x48] sm:$0xff]   ;;  %v2177_v12 = vld [vmem:[%s3110_s0 + $0x18] sm:$0xff]   ;;  %249 = vst [vmem:[#allocation2] sm:$0xff] %v2262_v27 }
   0x4   :  { %2133 = vmatprep.subr.bf16.mxu0 %v2172_v1  ;;  %v2183_v8 = vld [vmem:[%s3111_s3] sm:$0xff]   ;;  %1811 = vmatprep.subr.bf16.mxu1 %v2182_v7  ;;  %v2187_v13 = vld [vmem:[%s3111_s3 + $0x8] sm:$0xff]   ;;  %v2189_v16 = vld [vmem:[%s3111_s3 + $0x50] sm:$0xff]   ;;  %250 = vst [vmem:[#allocation2 + $0x8] sm:$0x3] %v2262_v27 }
   0x5   :  { %v2184_v9 = vld [vmem:[%s3111_s3 + $0xc0] sm:$0xff]   ;;  %1812 = vmatpush3.bf16.msra.mxu1 %v2183_v8  ;;  %v2188_v15 = vld [vmem:[%s3111_s3 + $0xc8] sm:$0xff]   ;;  %v2191_v18 = vld [vmem:[%s3111_s3 + $0x10] sm:$0xff]   ;;  %251 = vst [vmem:[#allocation2 + $0x10] sm:$0xff] %v2262_v27 }
   0x6   :  { %v2186_v11 = vld [vmem:[%s3111_s3 + $0x80] sm:$0xff]   ;;  %1813 = vmatprep.subr.bf16.mxu1 %v2185_v10  ;;  %v2190_v17 = vld [vmem:[%s3111_s3 + $0x88] sm:$0xff]   ;;  %v2192_v19 = vld [vmem:[%s3111_s3 + $0xd0] sm:$0xff]   ;;  %252 = vst [vmem:[#allocation2 + $0x18] sm:$0x3] %v2262_v27 }
   0x7   :  { %2134 = vmatpush3.bf16.msra.mxu0 %v2172_v1  ;;  %v2178_v14 = vld [vmem:[%s3110_s0 + $0x20] sm:$0xff]   ;;  %v2193_v20 = vld [vmem:[%s3111_s3 + $0x58] sm:$0xff]   ;;  %v2194_v21 = vld [vmem:[%s3111_s3 + $0x90] sm:$0xff]   ;;  %253 = vst [vmem:[#allocation2 + $0x20] sm:$0xff] %v2262_v27 }
   0x8   :  { %2169 = vmatprep.subr.msk.bf16.mxu0 %vm132_vm1, %v2173_v2  ;;  %v2179_v22 = vld [vmem:[%s3110_s0 + $0x28] sm:$0xff]   ;;  %v2195_v23 = vld [vmem:[%s3111_s3 + $0x18] sm:$0xff]   ;;  %v2180_v24 = vld [vmem:[%s3110_s0 + $0x30] sm:$0xff]   ;;  %254 = vst [vmem:[#allocation2 + $0x28] sm:$0x3] %v2262_v27 }
   0x9   :  { %1814 = vmatpush3.bf16.msra.mxu1 %v2187_v13  ;;  %v2196_v25 = vld [vmem:[%s3111_s3 + $0xd8] sm:$0xff]   ;;  %257 = vst [vmem:[#allocation2 + $0x40] sm:$0xff] %v2262_v27  ;;  %258 = vst [vmem:[#allocation2 + $0x48] sm:$0x3] %v2262_v27  ;;  %v2197_v28 = vld [vmem:[%s3111_s3 + $0x60] sm:$0xff]  }
   0xa   :  { %1815 = vmatprep.subr.bf16.mxu1 %v2189_v16  ;;  %v2181_v26 = vld [vmem:[%s3110_s0 + $0x38] sm:$0xff]   ;;  %259 = vst [vmem:[#allocation2 + $0x50] sm:$0xff] %v2262_v27  ;;  %260 = vst [vmem:[#allocation2 + $0x58] sm:$0x3] %v2262_v27  ;;  %v2199_v30 = vld [vmem:[%s3111_s3 + $0x20] sm:$0xff]  }
   0xb   :  { %2136 = vmatpush3.bf16.msra.mxu0 %v134_v4  ;;  %261 = vst [vmem:[#allocation2 + $0x60] sm:$0xff] %v2262_v27  ;;  %262 = vst [vmem:[#allocation2 + $0x68] sm:$0x3] %v2262_v27  ;;  %v2198_v29 = vld [vmem:[%s3111_s3 + $0x98] sm:$0xff]   ;;  %v2200_v31 = vld [vmem:[%s3111_s3 + $0xe0] sm:$0xff]  }
   0xc   :  { %1875 = vmatprep.subr.bf16.mxu0 %v2184_v9  ;;  %263 = vst [vmem:[#allocation2 + $0x70] sm:$0xff] %v2262_v27  ;;  %264 = vst [vmem:[#allocation2 + $0x78] sm:$0x3] %v2262_v27  ;;  %v2201_v32 = vld [vmem:[%s3111_s3 + $0x68] sm:$0xff]   ;;  %v2202_v33 = vld [vmem:[%s3111_s3 + $0xa0] sm:$0xff]  }
   0xd   :  { %1816 = vmatpush3.bf16.msra.mxu1 %v2191_v18  ;;  %265 = vst [vmem:[#allocation2 + $0x80] sm:$0xff] %v2262_v27  ;;  %266 = vst [vmem:[#allocation2 + $0x88] sm:$0x3] %v2262_v27  ;;  %v2203_v34 = vld [vmem:[%s3111_s3 + $0x28] sm:$0xff]   ;;  %v2205_v36 = vld [vmem:[%s3111_s3 + $0x70] sm:$0xff]  }
   0xe   :  { %2138 = vmatmul.mubr.msk.bf16.vlgmr.msra.gmra.mrb[0].mxu0 %vm107_vm0, %v2175_v5  ;;  %1817 = vmatprep.subr.bf16.mxu1 %v2193_v20  ;;  %267 = vst [vmem:[#allocation2 + $0x90] sm:$0xff] %v2262_v27  ;;  %268 = vst [vmem:[#allocation2 + $0x98] sm:$0x3] %v2262_v27  ;;  %v2204_v35 = vld [vmem:[%s3111_s3 + $0xe8] sm:$0xff]   ;;  %v2207_v38 = vld [vmem:[%s3111_s3 + $0x30] sm:$0xff]  }
   0xf   :  { %2141 = vmatprep.mubr.msk.bf16.mxu0 %vm107_vm0, %v2176_v6  ;;  %1876 = vmatpush3.bf16.msra.mxu0 %v2186_v11  ;;  %269 = vst [vmem:[#allocation2 + $0xa0] sm:$0xff] %v2262_v27  ;;  %270 = vst [vmem:[#allocation2 + $0xa8] sm:$0x3] %v2262_v27  ;;  %v2206_v37 = vld [vmem:[%s3111_s3 + $0xa8] sm:$0xff]   ;;  %v2208_v39 = vld [vmem:[%s3111_s3 + $0xf0] sm:$0xff]  }
  0x10   :  { %1877 = vmatprep.subr.bf16.mxu0 %v2188_v15  ;;  %271 = vst [vmem:[#allocation2 + $0xb0] sm:$0xff] %v2262_v27  ;;  %272 = vst [vmem:[#allocation2 + $0xb8] sm:$0x3] %v2262_v27  ;;  %v2209_v40 = vld [vmem:[%s3111_s3 + $0x78] sm:$0xff]   ;;  %v2210_v41 = vld [vmem:[%s3111_s3 + $0xb0] sm:$0xff]  }
  0x11   :  { %1818 = vmatpush3.bf16.msra.mxu1 %v2195_v23  ;;  %273 = vst [vmem:[#allocation2 + $0xc0] sm:$0xff] %v2262_v27  ;;  %274 = vst [vmem:[#allocation2 + $0xc8] sm:$0x3] %v2262_v27  ;;  %v2211_v42 = vld [vmem:[%s3111_s3 + $0x38] sm:$0xff]   ;;  %v2214_v45 = vld [vmem:[%s3111_s3 + $0x140] sm:$0xff]  }
  0x12   :  { %275 = vst [vmem:[#allocation2 + $0xd0] sm:$0xff] %v2262_v27  ;;  %276 = vst [vmem:[#allocation2 + $0xd8] sm:$0x3] %v2262_v27  ;;  %1819 = vmatprep.subr.bf16.mxu1 %v2197_v28  ;;  %v2212_v43 = vld [vmem:[%s3111_s3 + $0xf8] sm:$0xff]   ;;  %v2219_v46 = vld [vmem:[%s3111_s3 + $0x1c0] sm:$0xff]  }
  0x13   :  { %1878 = vmatpush3.bf16.msra.mxu0 %v2190_v17  ;;  %277 = vst [vmem:[#allocation2 + $0xe0] sm:$0xff] %v2262_v27  ;;  %278 = vst [vmem:[#allocation2 + $0xe8] sm:$0x3] %v2262_v27  ;;  %v2213_v44 = vld [vmem:[%s3111_s3 + $0xb8] sm:$0xff]   ;;  %v2484_v47 = vld [vmem:[%s3112_s2] ss:$0 sm:$0xff] }
  0x14   :  { %1879 = vmatprep.subr.bf16.mxu0 %v2192_v19  ;;  %279 = vst [vmem:[#allocation2 + $0xf0] sm:$0xff] %v2262_v27  ;;  %280 = vst [vmem:[#allocation2 + $0xf8] sm:$0x3] %v2262_v27  ;;  %v322_v56 = vld [vmem:[#allocation2 + $0x1] sm:$0xff] }
  0x15   :  { %281 = vst [vmem:[#allocation2 + $0x100] sm:$0xff] %v2262_v27  ;;  %282 = vst [vmem:[#allocation2 + $0x108] sm:$0x3] %v2262_v27  ;;  %1820 = vmatpush3.bf16.msra.mxu1 %v2199_v30  ;;  %v2215_v13 = vld [vmem:[%s3111_s3 + $0x100] sm:$0xff]   ;;  %v2216_v18 = vld [vmem:[%s3111_s3 + $0x148] sm:$0xff]  }
  0x16   :  { %2142 = vmatmul.mubr.msk.bf16.gmra.mrb[4].mxu0 %vm107_vm0, %v2177_v12  ;;  %283 = vst [vmem:[#allocation2 + $0x110] sm:$0xff] %v2262_v27  ;;  %284 = vst [vmem:[#allocation2 + $0x118] sm:$0x3] %v2262_v27  ;;  %1821 = vmatprep.subr.bf16.mxu1 %v2201_v32  ;;  %v338_v16 = vld [vmem:[#allocation2 + $0x2] sm:$0xff] }
  0x17   :  { %2145 = vmatprep.mubr.msk.bf16.mxu0 %vm107_vm0, %v2178_v14  ;;  %1880 = vmatpush3.bf16.msra.mxu0 %v2194_v21  ;;  %285 = vst [vmem:[#allocation2 + $0x120] sm:$0xff] %v2262_v27  ;;  %286 = vst [vmem:[#allocation2 + $0x128] sm:$0x3] %v2262_v27  ;;  %v2217_v30 = vld [vmem:[%s3111_s3 + $0x108] sm:$0xff]  }
  0x18   :  { %1881 = vmatprep.subr.bf16.mxu0 %v2196_v25  ;;  %287 = vst [vmem:[#allocation2 + $0x130] sm:$0xff] %v2262_v27  ;;  %288 = vst [vmem:[#allocation2 + $0x138] sm:$0x3] %v2262_v27  ;;  %v2221_v25 = vld [vmem:[%s3111_s3 + $0x180] sm:$0xff]  }
  0x19   :  { %1822 = vmatpush3.bf16.msra.mxu1 %v2203_v34 }
  0x1a   :  { %1823 = vmatprep.subr.bf16.mxu1 %v2205_v36 }
  0x1b   :  { %1882 = vmatpush3.bf16.msra.mxu0 %v2198_v29 }
  0x1c   :  { %1883 = vmatprep.subr.bf16.mxu0 %v2200_v31 }
  0x1d   :  { %1824 = vmatpush3.bf16.msra.mxu1 %v2207_v38  ;;  %v2218_v38 = vld [vmem:[%s3111_s3 + $0x150] sm:$0xff]  }
  0x1e   :  { %2146 = vmatmul.mubr.msk.bf16.gmra.mrb[8].mxu0 %vm107_vm0, %v2179_v22  ;;  %1825 = vmatprep.subr.bf16.mxu1 %v2209_v40 }
  0x1f   :  { %2149 = vmatprep.mubr.msk.bf16.mxu0 %vm107_vm0, %v2180_v24  ;;  %1884 = vmatpush3.bf16.msra.mxu0 %v2202_v33  ;;  %v2223_v33 = vld [vmem:[%s3111_s3 + $0x1c8] sm:$0xff]  }
  0x20   :  { %1885 = vmatprep.subr.bf16.mxu0 %v2204_v35 }
  0x21   :  { %1826 = vmatpush3.bf16.msra.mxu1 %v2211_v42 }
  0x22   :  { %1939 = vmatprep.subr.bf16.mxu1 %v2214_v45 }
  0x23   :  { %1886 = vmatpush3.bf16.msra.mxu0 %v2206_v37 }
  0x24   :  { %1887 = vmatprep.subr.bf16.mxu0 %v2208_v39 }
  0x26   :  { %2150 = vmatmul.mubr.msk.bf16.gmra.mrb[12].mxu0 %vm107_vm0, %v2181_v26 }
  0x27   :  { %1888 = vmatpush3.bf16.msra.mxu0 %v2210_v41 }
  0x28   :  { %1889 = vmatprep.subr.bf16.mxu0 %v2212_v43 }
  0x2b   :  { %1890 = vmatpush3.bf16.msra.mxu0 %v2213_v44  ;;  %v2225_v44 = vld [vmem:[%s3111_s3 + $0x188] sm:$0xff]  }
  0x2c   :  { %2003 = vmatprep.subr.bf16.mxu0 %v2219_v46  ;;  %v2220_v46 = vld [vmem:[%s3111_s3 + $0x110] sm:$0xff]  }
  0xe1   :  { %v2139_v48 = vpop.f32.mrb[0].mxu0 }
  0xe2   :  { %v179_v49 = vadd.f32 %v2139_v48, %v2484_v47  ;;  %v170_v50 = vpop.f32.mrb[1].mxu0 }
  0xe3   :  { %v171_v51 = vadd.f32 %v2484_v47, %v170_v50  ;;  %v2140_v52 = vpop.f32.mrb[2].mxu0 }
  0xe4   :  { %v2488_v53 = vmax.f32 %v179_v49, 0.0  ;;  %v182_v54 = vadd.f32 %v2140_v52, %v2484_v47  ;;  %v173_v55 = vpop.f32.mrb[3].mxu0  ;;  %v2227_v52 = vld [vmem:[%s3111_s3 + $0x1d0] sm:$0xff]  }
  0xe5   :  { %v2491_v57 = vmax.f32 %v171_v51, 0.0  ;;  %v174_v58 = vadd.f32 %v2484_v47, %v173_v55  ;;  %v2222_v51 = vld [vmem:[%s3111_s3 + $0x158] sm:$0xff]  }
  0xe6   :  { %292 = vst [vmem:[#allocation2 + $0x31] sm:$0xff] %v2488_v53  ;;  %v2495_v59 = vmax.f32 %v182_v54, 0.0 }
  0xe7   :  { %290 = vst [vmem:[#allocation2 + $0x11] sm:$0xff] %v2491_v57  ;;  %v2498_v60 = vmax.f32 %v174_v58, 0.0  ;;  %v468_v61 = vpack.c.bf16 %v2491_v57, %v322_v56 }
  0xe8   :  { %293 = vst [vmem:[#allocation2 + $0x41] sm:$0xff] %v2495_v59  ;;  %v481_v62 = vpack.c.bf16 %v2495_v59, %v2488_v53 }
  0xe9   :  { %291 = vst [vmem:[#allocation2 + $0x21] sm:$0xff] %v2498_v60  ;;  %v2143_v63 = vpop.f32.mrb[4].mxu0  ;;  %1226 = vmatprep.mubr.bf16.mxu1 %v468_v61  ;;  %v2507_v0 = vpack.c.bf16 %v2488_v53, %v2498_v60  ;;  %v471_v1 = vpack.c.bf16 %v2498_v60, %v2491_v57  ;;  %v2251_v57 = vld [vmem:[%s3111_s3 + $0x210] sm:$0xff]   ;;  %v2252_v60 = vld [vmem:[%s3111_s3 + $0x258] sm:$0xff]   ;;  %v2255_v53 = vld [vmem:[%s3111_s3 + $0x220] sm:$0xff]  }
  0xea   :  { %v195_v2 = vadd.f32 %v2143_v63, %v2484_v47  ;;  %v186_v3 = vpop.f32.mrb[5].mxu0 }
  0xeb   :  { %v187_v4 = vadd.f32 %v2484_v47, %v186_v3  ;;  %v2144_v5 = vpop.f32.mrb[6].mxu0 }
  0xec   :  { %v2513_v6 = vmax.f32 %v195_v2, 0.0  ;;  %v198_v7 = vadd.f32 %v2144_v5, %v2484_v47  ;;  %v189_v8 = vpop.f32.mrb[7].mxu0  ;;  %v2229_v2 = vld [vmem:[%s3111_s3 + $0x190] sm:$0xff]  }
  0xed   :  { %v2516_v9 = vmax.f32 %v187_v4, 0.0  ;;  %v190_v10 = vadd.f32 %v2484_v47, %v189_v8  ;;  %v356_v29 = vld [vmem:[#allocation2 + $0x30] sm:$0xff] }
  0xee   :  { %296 = vst [vmem:[#allocation2 + $0x71] sm:$0xff] %v2513_v6  ;;  %v2520_v11 = vmax.f32 %v198_v7, 0.0  ;;  %v307_v12 = vld [vmem:[#allocation2 + $0x10] sm:$0xff]  ;;  %v2224_v7 = vld [vmem:[%s3111_s3 + $0x118] sm:$0xff]  }
  0xef   :  { %294 = vst [vmem:[#allocation2 + $0x51] sm:$0xff] %v2516_v9  ;;  %v2526_v14 = vmax.f32 %v190_v10, 0.0  ;;  %v467_v15 = vpack.c.bf16 %v307_v12, %v2262_v27  ;;  %v2529_v17 = vld [vmem:[#allocation2 + $0x12] sm:$0xff]  ;;  %v2536_v19 = vpack.c.bf16 %v2516_v9, %v2495_v59  ;;  %v2539_v21 = vld [vmem:[#allocation2 + $0x40] sm:$0xff]  ;;  %v2256_v59 = vld [vmem:[%s3111_s3 + $0x268] sm:$0xff]  }
  0xf0   :  { %297 = vst [vmem:[#allocation2 + $0x81] sm:$0xff] %v2520_v11  ;;  %v355_v20 = vld [vmem:[#allocation2 + $0x20] sm:$0xff]  ;;  %v501_v22 = vpack.c.bf16 %v2520_v11, %v2513_v6  ;;  %v469_v28 = vpack.c.bf16 %v2529_v17, %v338_v16  ;;  %v480_v35 = vpack.c.bf16 %v2539_v21, %v356_v29  ;;  %v2601_v58 = vld [vmem:[#allocation2 + $0x32] sm:$0xff] }
  0xf1   :  { %295 = vst [vmem:[#allocation2 + $0x61] sm:$0xff] %v2526_v14  ;;  %1227 = vmatmul.mubr.bf16.vlgmr.msra.gmra.mrb[0].mxu1 %v467_v15  ;;  %v470_v23 = vpack.c.bf16 %v355_v20, %v307_v12  ;;  %v2147_v24 = vpop.f32.mrb[8].mxu0  ;;  %v2549_v26 = vpack.c.bf16 %v2513_v6, %v2526_v14  ;;  %v491_v34 = vpack.c.bf16 %v2526_v14, %v2516_v9  ;;  %v2584_v49 = vld [vmem:[#allocation2 + $0x22] sm:$0xff]  ;;  %v2231_v10 = vld [vmem:[%s3111_s3 + $0x1d8] sm:$0xff]   ;;  %v2259_v9 = vld [vmem:[%s3111_s3 + $0x230] sm:$0xff]  }
  0xf2   :  { %1940 = vmatpush3.bf16.msra.mxu1 %v2215_v13  ;;  %1234 = vmatprep.mubr.bf16.mxu1 %v2507_v0  ;;  %v211_v31 = vadd.f32 %v2147_v24, %v2484_v47  ;;  %v202_v32 = vpop.f32.mrb[9].mxu0  ;;  %v2582_v48 = vpack.c.bf16 %v356_v29, %v355_v20  ;;  %v2611_v3 = vpack.c.bf16 %v2601_v58, %v2584_v49  ;;  %v2226_v15 = vld [vmem:[%s3111_s3 + $0x160] sm:$0xff]   ;;  %v2260_v14 = vld [vmem:[%s3111_s3 + $0x278] sm:$0xff]  }
  0xf3   :  { %1323 = vmatprep.mubr.bf16.mxu0 %v470_v23  ;;  %1941 = vmatprep.subr.bf16.mxu1 %v2216_v18  ;;  %v203_v36 = vadd.f32 %v2484_v47, %v202_v32  ;;  %v2148_v37 = vpop.f32.mrb[10].mxu0 }
  0xf4   :  { %1324 = vmatmul.mubr.bf16.vlgmr.msra.gmra.mrb[16].mxu0 %v469_v28  ;;  %v2567_v39 = vmax.f32 %v211_v31, 0.0  ;;  %v214_v40 = vadd.f32 %v2148_v37, %v2484_v47  ;;  %v205_v41 = vpop.f32.mrb[11].mxu0  ;;  %v2233_v28 = vld [vmem:[%s3111_s3 + $0x198] sm:$0xff]  }
  0xf5   :  { %1331 = vmatprep.mubr.bf16.mxu0 %v480_v35  ;;  %v2570_v42 = vmax.f32 %v203_v36, 0.0  ;;  %v206_v43 = vadd.f32 %v2484_v47, %v205_v41  ;;  %2004 = vmatpush3.bf16.msra.mxu0 %v2221_v25  ;;  %v2235_v36 = vld [vmem:[%s3111_s3 + $0x1e0] sm:$0xff]   ;;  %v360_v37 = vld [vmem:[#allocation2 + $0x70] sm:$0xff] }
  0xf6   :  { %1942 = vmatpush3.bf16.msra.mxu1 %v2217_v30  ;;  %300 = vst [vmem:[#allocation2 + $0xd1] sm:$0xff] %v2567_v39  ;;  %v2577_v45 = vmax.f32 %v214_v40, 0.0  ;;  %2005 = vmatprep.subr.bf16.mxu0 %v2223_v33  ;;  %v358_v54 = vld [vmem:[#allocation2 + $0x50] sm:$0xff]  ;;  %v2228_v30 = vld [vmem:[%s3111_s3 + $0x120] sm:$0xff]   ;;  %v2230_v33 = vld [vmem:[%s3111_s3 + $0x168] sm:$0xff]  }
  0xf7   :  { %298 = vst [vmem:[#allocation2 + $0xb1] sm:$0xff] %v2570_v42  ;;  %v2587_v50 = vmax.f32 %v206_v43, 0.0  ;;  %1943 = vmatprep.subr.bf16.mxu1 %v2218_v38  ;;  %v2648_v31 = vpack.c.bf16 %v358_v54, %v2539_v21  ;;  %v2664_v21 = vld [vmem:[#allocation2 + $0x80] sm:$0xff] }
  0xf8   :  { %301 = vst [vmem:[#allocation2 + $0xe1] sm:$0xff] %v2577_v45  ;;  %v2596_v55 = vld [vmem:[#allocation2 + $0x60] sm:$0xff]  ;;  %v521_v56 = vpack.c.bf16 %v2577_v45, %v2567_v39 }
  0xf9   :  { %1235 = vmatmul.mubr.bf16.gmra.mrb[4].mxu1 %v2582_v48  ;;  %299 = vst [vmem:[#allocation2 + $0xc1] sm:$0xff] %v2587_v50  ;;  %v2151_v61 = vpop.f32.mrb[12].mxu0  ;;  %v490_v63 = vpack.c.bf16 %v2596_v55, %v358_v54  ;;  %2006 = vmatpush3.bf16.msra.mxu0 %v2225_v44  ;;  %v2619_v8 = vpack.c.bf16 %v2567_v39, %v2587_v50  ;;  %v2670_v40 = vld [vmem:[#allocation2 + $0x42] sm:$0xff]  ;;  %v457_v39 = vld [vmem:[%s3113_s5 + $0x30] sm:$0xff] }
  0xfa   :  { %1242 = vmatprep.mubr.bf16.mxu1 %v2536_v19  ;;  %v227_v4 = vadd.f32 %v2151_v61, %v2484_v47  ;;  %v218_v5 = vpop.f32.mrb[13].mxu0  ;;  %1944 = vmatpush3.bf16.msra.mxu1 %v2220_v46  ;;  %v511_v16 = vpack.c.bf16 %v2587_v50, %v2570_v42  ;;  %v2237_v41 = vld [vmem:[%s3111_s3 + $0x1a0] sm:$0xff]   ;;  %v2232_v44 = vld [vmem:[%s3111_s3 + $0x128] sm:$0xff]   ;;  %v500_v54 = vpack.c.bf16 %v2664_v21, %v360_v37  ;;  %v2234_v61 = vld [vmem:[%s3111_s3 + $0x170] sm:$0xff]  }
  0xfb   :  { %v219_v12 = vadd.f32 %v2484_v47, %v218_v5  ;;  %1945 = vmatprep.subr.bf16.mxu1 %v2222_v51  ;;  %v2152_v13 = vpop.f32.mrb[14].mxu0  ;;  %2007 = vmatprep.subr.bf16.mxu0 %v2227_v52  ;;  %v2238_v51 = vld [vmem:[%s3111_s3 + $0x1e8] sm:$0xff]   ;;  %v434_v50 = vld [vmem:[#allocation2 + $0x131] sm:$0xff] }
  0xfc   :  { %1332 = vmatmul.mubr.bf16.gmra.mrb[20].mxu0 %v2611_v3  ;;  %v2631_v18 = vmax.f32 %v227_v4, 0.0  ;;  %v230_v20 = vadd.f32 %v2152_v13, %v2484_v47  ;;  %v221_v23 = vpop.f32.mrb[15].mxu0  ;;  %v2240_v4 = vld [vmem:[%s3111_s3 + $0x1a8] sm:$0xff]  }
  0xfd   :  { %1339 = vmatprep.mubr.bf16.mxu0 %v490_v63  ;;  %v2634_v24 = vmax.f32 %v219_v12, 0.0  ;;  %v222_v25 = vadd.f32 %v2484_v47, %v221_v23  ;;  %2008 = vmatpush3.bf16.msra.mxu0 %v2229_v2  ;;  %v2650_v47 = vld [vmem:[#allocation2 + $0x52] sm:$0xff]  ;;  %v330_v63 = vld [vmem:[#allocation2 + $0xa1] sm:$0xff]  ;;  %v2708_v12 = vpack.c.bf16 %v360_v37, %v2596_v55 }
  0xfe   :  { %304 = vst [vmem:[#allocation2 + $0x111] sm:$0xff] %v2631_v18  ;;  %1946 = vmatpush3.bf16.msra.mxu1 %v2224_v7  ;;  %v2641_v29 = vmax.f32 %v230_v20, 0.0  ;;  %2009 = vmatprep.subr.bf16.mxu0 %v2231_v10  ;;  %v2679_v43 = vpack.c.bf16 %v2650_v47, %v2670_v40  ;;  %v2236_v2 = vld [vmem:[%s3111_s3 + $0x130] sm:$0xff]   ;;  %v2239_v10 = vld [vmem:[%s3111_s3 + $0x178] sm:$0xff]   ;;  %v2710_v13 = vld [vmem:[#allocation2 + $0x62] sm:$0xff]  ;;  %v508_v23 = vpack.c.bf16 %v2570_v42, %v330_v63 }
  0xff   :  { %302 = vst [vmem:[#allocation2 + $0xf1] sm:$0xff] %v2634_v24  ;;  %v2652_v32 = vmax.f32 %v222_v25, 0.0  ;;  %1947 = vmatprep.subr.bf16.mxu1 %v2226_v15  ;;  %v2659_v35 = vpack.c.bf16 %v2634_v24, %v2577_v45  ;;  %v362_v5 = vld [vmem:[#allocation2 + $0xb0] sm:$0xff]  ;;  %v458_v45 = vld [vmem:[%s3113_s5 + $0x38] sm:$0xff] }
 0x100   :  { %305 = vst [vmem:[#allocation2 + $0x121] sm:$0xff] %v2641_v29  ;;  %v541_v38 = vpack.c.bf16 %v2641_v29, %v2631_v18  ;;  %v363_v7 = vld [vmem:[#allocation2 + $0xc0] sm:$0xff]  ;;  %v2712_v15 = vld [vmem:[#allocation2 + $0x72] sm:$0xff]  ;;  %v507_v37 = vpack.c.bf16 %v362_v5, %v2262_v27 }
 0x101   :  { %1243 = vmatmul.mubr.bf16.gmra.mrb[8].mxu1 %v2648_v31  ;;  %303 = vst [vmem:[#allocation2 + $0x101] sm:$0xff] %v2652_v32  ;;  %2010 = vmatpush3.bf16.msra.mxu0 %v2233_v28  ;;  %v2686_v46 = vpack.c.bf16 %v2631_v18, %v2652_v32  ;;  %v531_v52 = vpack.c.bf16 %v2652_v32, %v2634_v24  ;;  %v2242_v20 = vld [vmem:[%s3111_s3 + $0x1f0] sm:$0xff]   ;;  %v452_v24 = vld [vmem:[%s3113_s5 + $0x8] sm:$0xff] }
 0x102   :  { %1250 = vmatprep.mubr.bf16.mxu1 %v2549_v26  ;;  %1948 = vmatpush3.bf16.msra.mxu1 %v2228_v30  ;;  %v510_v25 = vpack.c.bf16 %v363_v7, %v362_v5  ;;  %v2243_v55 = vld [vmem:[%s3111_s3 + $0x1b0] sm:$0xff]   ;;  %v2724_v28 = vpack.c.bf16 %v2712_v15, %v2710_v13  ;;  %v2241_v30 = vld [vmem:[%s3111_s3 + $0x138] sm:$0xff]  }
 0x103   :  { %1949 = vmatprep.subr.bf16.mxu1 %v2230_v33  ;;  %2011 = vmatprep.subr.bf16.mxu0 %v2235_v36  ;;  %v2244_v33 = vld [vmem:[%s3111_s3 + $0x1f8] sm:$0xff]   ;;  %v2246_v36 = vld [vmem:[%s3111_s3 + $0x240] sm:$0xff]   ;;  %v453_v18 = vld [vmem:[%s3113_s5 + $0x10] sm:$0xff] }
 0x104   :  { %1340 = vmatmul.mubr.bf16.gmra.mrb[24].mxu0 %v2679_v43 }
 0x105   :  { %1347 = vmatprep.mubr.bf16.mxu0 %v500_v54  ;;  %2012 = vmatpush3.bf16.msra.mxu0 %v2237_v41  ;;  %v2245_v41 = vld [vmem:[%s3111_s3 + $0x1b8] sm:$0xff]   ;;  %v364_v54 = vld [vmem:[#allocation2 + $0xd0] sm:$0xff] }
 0x106   :  { %1950 = vmatpush3.bf16.msra.mxu1 %v2232_v44  ;;  %2013 = vmatprep.subr.bf16.mxu0 %v2238_v51  ;;  %v346_v44 = vld [vmem:[#allocation2 + $0xa2] sm:$0xff]  ;;  %v2740_v51 = vld [vmem:[#allocation2 + $0xb2] sm:$0xff]  ;;  %v2744_v5 = vpack.c.bf16 %v364_v54, %v363_v7 }
 0x107   :  { %1951 = vmatprep.subr.bf16.mxu1 %v2234_v61  ;;  %v365_v61 = vld [vmem:[#allocation2 + $0xe0] sm:$0xff]  ;;  %v509_v63 = vpack.c.bf16 %v2740_v51, %v346_v44 }
 0x108   :  { %v2759_v7 = vld [vmem:[#allocation2 + $0xe2] sm:$0xff] }
 0x109   :  { %1251 = vmatmul.mubr.bf16.gmra.mrb[12].mxu1 %v2708_v12  ;;  %2014 = vmatpush3.bf16.msra.mxu0 %v2240_v4  ;;  %v367_v4 = vld [vmem:[#allocation2 + $0x100] sm:$0xff] }
 0x10a   :  { %1258 = vmatprep.mubr.bf16.mxu1 %v508_v23  ;;  %1952 = vmatpush3.bf16.msra.mxu1 %v2236_v2  ;;  %v520_v2 = vpack.c.bf16 %v365_v61, %v364_v54  ;;  %v366_v23 = vld [vmem:[#allocation2 + $0xf0] sm:$0xff] }
 0x10b   :  { %1953 = vmatprep.subr.bf16.mxu1 %v2239_v10  ;;  %2015 = vmatprep.subr.bf16.mxu0 %v2242_v20  ;;  %v2746_v10 = vld [vmem:[#allocation2 + $0xc2] sm:$0xff]  ;;  %v2748_v20 = vld [vmem:[#allocation2 + $0xd2] sm:$0xff] }
 0x10c   :  { %1348 = vmatmul.mubr.bf16.gmra.mrb[28].mxu0 %v2724_v28  ;;  %v522_v6 = vpack.c.bf16 %v2759_v7, %v2748_v20 }
 0x10d   :  { %1355 = vmatprep.mubr.bf16.mxu0 %v510_v25  ;;  %2016 = vmatpush3.bf16.msra.mxu0 %v2243_v55  ;;  %v530_v25 = vpack.c.bf16 %v367_v4, %v366_v23  ;;  %v2754_v55 = vpack.c.bf16 %v2748_v20, %v2746_v10  ;;  %v455_v20 = vld [vmem:[%s3113_s5 + $0x20] sm:$0xff] }
 0x10e   :  { %1954 = vmatpush3.bf16.msra.mxu1 %v2241_v30  ;;  %2017 = vmatprep.subr.bf16.mxu0 %v2244_v33  ;;  %v2757_v30 = vpack.c.bf16 %v366_v23, %v365_v61  ;;  %v2761_v33 = vld [vmem:[#allocation2 + $0xf2] sm:$0xff]  ;;  %v2775_v61 = vld [vmem:[#allocation2 + $0x102] sm:$0xff] }
 0x10f   :  { %2153 = vmatprep.subr.bf16.mxu1 %v2246_v36 }
 0x111   :  { %1259 = vmatmul.mubr.bf16.gmra.mrb[16].mxu1 %v507_v37  ;;  %2018 = vmatpush3.bf16.msra.mxu0 %v2245_v41  ;;  %v2763_v37 = vld [vmem:[#allocation2 + $0x120] sm:$0xff]  ;;  %v2769_v41 = vpack.c.bf16 %v2761_v33, %v2759_v7 }
 0x112   :  { %1266 = vmatprep.mubr.bf16.mxu1 %v2619_v8  ;;  %2067 = vmatprep.subr.bf16.mxu0 %v2246_v36  ;;  %v368_v36 = vld [vmem:[#allocation2 + $0x110] sm:$0xff] }
 0x113   :  { %v540_v44 = vpack.c.bf16 %v2763_v37, %v368_v36  ;;  %v2773_v54 = vpack.c.bf16 %v368_v36, %v367_v4  ;;  %v2247_v4 = vld [vmem:[%s3111_s3 + $0x200] sm:$0xff]  }
 0x114   :  { %1356 = vmatmul.mubr.bf16.gmra.mrb[32].mxu0 %v509_v63  ;;  %v2777_v63 = vld [vmem:[#allocation2 + $0x112] sm:$0xff] }
 0x115   :  { %1363 = vmatprep.mubr.bf16.mxu0 %v520_v2  ;;  %v472_v2 = vpack.c.bf16 %v2584_v49, %v2529_v17  ;;  %v2784_v23 = vpack.c.bf16 %v2777_v63, %v2775_v61  ;;  %v482_v17 = vpack.c.bf16 %v2670_v40, %v2601_v58  ;;  %v2250_v49 = vld [vmem:[%s3111_s3 + $0x250] sm:$0xff]   ;;  %v2826_v58 = vld [vmem:[#allocation2 + $0x82] sm:$0xff] }
 0x116   :  { %v2258_v40 = vld [vmem:[%s3111_s3 + $0x270] sm:$0xff]  }
 0x119   :  { %1267 = vmatmul.mubr.bf16.gmra.mrb[20].mxu1 %v2744_v5 }
 0x11a   :  { %1274 = vmatprep.mubr.bf16.mxu1 %v2659_v35 }
 0x11c   :  { %1364 = vmatmul.mubr.bf16.gmra.mrb[36].mxu0 %v2754_v55 }
 0x11d   :  { %1371 = vmatprep.mubr.bf16.mxu0 %v530_v25  ;;  %v2248_v25 = vld [vmem:[%s3111_s3 + $0x248] sm:$0xff]  }
 0x121   :  { %1275 = vmatmul.mubr.bf16.gmra.mrb[24].mxu1 %v2757_v30 }
 0x122   :  { %1282 = vmatprep.mubr.bf16.mxu1 %v2686_v46 }
 0x124   :  { %1372 = vmatmul.mubr.bf16.gmra.mrb[40].mxu0 %v2769_v41 }
 0x125   :  { %1379 = vmatprep.mubr.bf16.mxu0 %v540_v44 }
 0x129   :  { %1283 = vmatmul.mubr.bf16.gmra.mrb[28].mxu1 %v2773_v54 }
 0x12a   :  { %1420 = vmatprep.mubr.bf16.mxu1 %v472_v2 }
 0x12c   :  { %1380 = vmatmul.mubr.bf16.gmra.mrb[44].mxu0 %v2784_v23 }
 0x12d   :  { %1517 = vmatprep.mubr.bf16.mxu0 %v2507_v0  ;;  %v2249_v0 = vld [vmem:[%s3111_s3 + $0x208] sm:$0xff]  }
 0x131   :  { %1421 = vmatmul.mubr.bf16.vlgmr.msra.gmra.mrb[32].mxu1 %v471_v1  ;;  %v492_v1 = vpack.c.bf16 %v2710_v13, %v2650_v47  ;;  %v2261_v13 = vld [vmem:[%s3111_s3 + $0x238] sm:$0xff]  }
 0x132   :  { %2161 = vmatpush3.bf16.msra.mxu1 %v2247_v4  ;;  %1428 = vmatprep.mubr.bf16.mxu1 %v482_v17 }
 0x133   :  { %2154 = vmatprep.subr.bf16.mxu1 %v2248_v25 }
 0x134   :  { %1518 = vmatmul.mubr.bf16.vlgmr.msra.gmra.mrb[48].mxu0 %v2582_v48  ;;  %v2254_v48 = vld [vmem:[%s3111_s3 + $0x260] sm:$0xff]  }
 0x135   :  { %1525 = vmatprep.mubr.bf16.mxu0 %v2536_v19  ;;  %2068 = vmatpush3.bf16.msra.mxu0 %v2247_v4  ;;  %v2253_v19 = vld [vmem:[%s3111_s3 + $0x218] sm:$0xff]  }
 0x136   :  { %2162 = vmatpush3.bf16.msra.mxu1 %v2249_v0  ;;  %2069 = vmatprep.subr.bf16.mxu0 %v2248_v25 }
 0x137   :  { %2155 = vmatprep.subr.bf16.mxu1 %v2250_v49 }
 0x139   :  { %1429 = vmatmul.mubr.bf16.gmra.mrb[36].mxu1 %v481_v62  ;;  %2070 = vmatpush3.bf16.msra.mxu0 %v2249_v0  ;;  %v502_v62 = vpack.c.bf16 %v2826_v58, %v2712_v15 }
 0x13a   :  { %1436 = vmatprep.mubr.bf16.mxu1 %v492_v1  ;;  %2163 = vmatpush3.bf16.msra.mxu1 %v2251_v57 }
 0x13b   :  { %2156 = vmatprep.subr.bf16.mxu1 %v2252_v60  ;;  %2071 = vmatprep.subr.bf16.mxu0 %v2250_v49 }
 0x13c   :  { %1526 = vmatmul.mubr.bf16.gmra.mrb[52].mxu0 %v2648_v31  ;;  %v426_v31 = vld [vmem:[#allocation2 + $0x91] sm:$0xff] }
 0x13d   :  { %1533 = vmatprep.mubr.bf16.mxu0 %v2549_v26  ;;  %2072 = vmatpush3.bf16.msra.mxu0 %v2251_v57  ;;  %v2257_v26 = vld [vmem:[%s3111_s3 + $0x228] sm:$0xff]   ;;  %v504_v47 = vpack.c.bf16 %v426_v31, %v2520_v11  ;;  %v532_v11 = vpack.c.bf16 %v2775_v61, %v2761_v33  ;;  %v463_v33 = vld [vmem:[%s3113_s5 + $0x60] sm:$0xff] }
 0x13e   :  { %2164 = vmatpush3.bf16.msra.mxu1 %v2253_v19  ;;  %2073 = vmatprep.subr.bf16.mxu0 %v2252_v60 }
 0x13f   :  { %2157 = vmatprep.subr.bf16.mxu1 %v2254_v48 }
 0x141   :  { %1437 = vmatmul.mubr.bf16.gmra.mrb[40].mxu1 %v491_v34  ;;  %2074 = vmatpush3.bf16.msra.mxu0 %v2253_v19  ;;  %v512_v34 = vpack.c.bf16 %v2746_v10, %v2740_v51  ;;  %v461_v51 = vld [vmem:[%s3113_s5 + $0x50] sm:$0xff] }
 0x142   :  { %1444 = vmatprep.mubr.bf16.mxu1 %v502_v62  ;;  %2165 = vmatpush3.bf16.msra.mxu1 %v2255_v53 }
 0x143   :  { %2158 = vmatprep.subr.bf16.mxu1 %v2256_v59  ;;  %2075 = vmatprep.subr.bf16.mxu0 %v2254_v48 }
 0x144   :  { %1534 = vmatmul.mubr.bf16.gmra.mrb[56].mxu0 %v2708_v12  ;;  %v503_v12 = vpack.c.bf16 %v2262_v27, %v2664_v21  ;;  %v459_v21 = vld [vmem:[%s3113_s5 + $0x40] sm:$0xff] }
 0x145   :  { %1541 = vmatprep.mubr.bf16.mxu0 %v504_v47  ;;  %2076 = vmatpush3.bf16.msra.mxu0 %v2255_v53 }
 0x146   :  { %2166 = vmatpush3.bf16.msra.mxu1 %v2257_v26  ;;  %2077 = vmatprep.subr.bf16.mxu0 %v2256_v59 }
 0x147   :  { %2159 = vmatprep.subr.bf16.mxu1 %v2258_v40 }
 0x149   :  { %1445 = vmatmul.mubr.bf16.gmra.mrb[44].mxu1 %v501_v22  ;;  %2078 = vmatpush3.bf16.msra.mxu0 %v2257_v26  ;;  %v401_v22 = vld [vmem:[#allocation2 + $0x122] sm:$0xff] }
 0x14a   :  { %1452 = vmatprep.mubr.bf16.mxu1 %v512_v34  ;;  %2167 = vmatpush3.bf16.msra.mxu1 %v2259_v9  ;;  %v542_v42 = vpack.c.bf16 %v401_v22, %v2777_v63 }
 0x14b   :  { %2160 = vmatprep.subr.bf16.mxu1 %v2260_v14  ;;  %2079 = vmatprep.subr.bf16.mxu0 %v2258_v40 }
 0x14c   :  { %1542 = vmatmul.mubr.bf16.gmra.mrb[60].mxu0 %v503_v12 }
 0x14d   :  { %1549 = vmatprep.mubr.bf16.mxu0 %v2619_v8  ;;  %2080 = vmatpush3.bf16.msra.mxu0 %v2259_v9  ;;  %v544_v8 = vpack.c.bf16 %v434_v50, %v2641_v29 }
 0x14e   :  { %2168 = vmatpush3.bf16.msra.mxu1 %v2261_v13  ;;  %2081 = vmatprep.subr.bf16.mxu0 %v2260_v14 }
 0x151   :  { %1453 = vmatmul.mubr.bf16.gmra.mrb[48].mxu1 %v511_v16  ;;  %2082 = vmatpush3.bf16.msra.mxu0 %v2261_v13  ;;  %v451_v16 = vld [vmem:[%s3113_s5] sm:$0xff] }
 0x152   :  { %1460 = vmatprep.mubr.bf16.mxu1 %v522_v6  ;;  %v476_v32 = vpack.c.bf16 %v452_v24, %v451_v16 }
 0x154   :  { %1550 = vmatmul.mubr.bf16.gmra.mrb[64].mxu0 %v2744_v5  ;;  %v462_v5 = vld [vmem:[%s3113_s5 + $0x58] sm:$0xff] }
 0x155   :  { %1557 = vmatprep.mubr.bf16.mxu0 %v2659_v35  ;;  %v543_v35 = vpack.c.bf16 %v2262_v27, %v2763_v37  ;;  %v454_v27 = vld [vmem:[%s3113_s5 + $0x18] sm:$0xff]  ;;  %v526_v10 = vpack.c.bf16 %v462_v5, %v461_v51 }
 0x156   :  { %v466_v37 = vld [vmem:[%s3113_s5 + $0x78] sm:$0xff] }
 0x159   :  { %1461 = vmatmul.mubr.bf16.gmra.mrb[52].mxu1 %v521_v56  ;;  %v506_v56 = vpack.c.bf16 %v458_v45, %v457_v39 }
 0x15a   :  { %1468 = vmatprep.mubr.bf16.mxu1 %v532_v11 }
 0x15c   :  { %1558 = vmatmul.mubr.bf16.gmra.mrb[68].mxu0 %v2757_v30  ;;  %v456_v30 = vld [vmem:[%s3113_s5 + $0x28] sm:$0xff] }
 0x15d   :  { %1565 = vmatprep.mubr.bf16.mxu0 %v2686_v46  ;;  %v460_v46 = vld [vmem:[%s3113_s5 + $0x48] sm:$0xff]  ;;  %v496_v7 = vpack.c.bf16 %v456_v30, %v455_v20 }
 0x15e   :  { %v516_v15 = vpack.c.bf16 %v460_v46, %v459_v21 }
 0x161   :  { %1469 = vmatmul.mubr.bf16.gmra.mrb[56].mxu1 %v531_v52  ;;  %v442_v52 = vld [vmem:[#allocation2 + $0x92] sm:$0xff] }
 0x162   :  { %1476 = vmatprep.mubr.bf16.mxu1 %v542_v42  ;;  %v505_v29 = vpack.c.bf16 %v442_v52, %v2826_v58 }
 0x164   :  { %1566 = vmatmul.mubr.bf16.gmra.mrb[72].mxu0 %v2773_v54 }
 0x165   :  { %1573 = vmatprep.mubr.bf16.mxu0 %v544_v8 }
 0x169   :  { %1477 = vmatmul.mubr.bf16.gmra.mrb[60].mxu1 %v541_v38  ;;  %v486_v38 = vpack.c.bf16 %v454_v27, %v453_v18 }
 0x16a   :  { %1638 = vmatprep.mubr.bf16.mxu1 %v506_v56 }
 0x16c   :  { %1574 = vmatmul.mubr.bf16.gmra.mrb[76].mxu0 %v543_v35 }
 0x16d   :  { %1614 = vmatprep.mubr.bf16.mxu0 %v476_v32 }
 0x171   :  { %1639 = vmatmul.mubr.bf16.vlgmr.msra.gmra.mrb[64].mxu1 %v505_v29 }
 0x172   :  { %1646 = vmatprep.mubr.bf16.mxu1 %v516_v15 }
 0x174   :  { %1615 = vmatmul.mubr.bf16.vlgmr.msra.gmra.mrb[80].mxu0 %v2611_v3  ;;  %v464_v3 = vld [vmem:[%s3113_s5 + $0x68] sm:$0xff] }
 0x175   :  { %1622 = vmatprep.mubr.bf16.mxu0 %v486_v38  ;;  %v536_v36 = vpack.c.bf16 %v464_v3, %v463_v33 }
 0x179   :  { %1647 = vmatmul.mubr.bf16.gmra.mrb[68].mxu1 %v2754_v55  ;;  %v465_v55 = vld [vmem:[%s3113_s5 + $0x70] sm:$0xff] }
 0x17a   :  { %1654 = vmatprep.mubr.bf16.mxu1 %v526_v10  ;;  %v546_v44 = vpack.c.bf16 %v466_v37, %v465_v55 }
 0x17c   :  { %1623 = vmatmul.mubr.bf16.gmra.mrb[84].mxu0 %v2679_v43  ;;  %v450_v43 = vld [vmem:[#allocation2 + $0x132] sm:$0xff] }
 0x17d   :  { %1630 = vmatprep.mubr.bf16.mxu0 %v496_v7  ;;  %v545_v54 = vpack.c.bf16 %v450_v43, %v401_v22 }
 0x181   :  { %1655 = vmatmul.mubr.bf16.gmra.mrb[72].mxu1 %v2769_v41  ;;  %v2947_v41 = vld [vmem:[%s3114_s4] ss:$0 sm:$0xff] }
 0x182   :  { %1662 = vmatprep.mubr.bf16.mxu1 %v536_v36 }
 0x184   :  { %1631 = vmatmul.mubr.bf16.gmra.mrb[88].mxu0 %v2724_v28 }
 0x189   :  { %1663 = vmatmul.mubr.bf16.gmra.mrb[76].mxu1 %v2784_v23 }
 0x18a   :  { %1670 = vmatprep.mubr.bf16.mxu1 %v546_v44 }
 0x191   :  { %1671 = vmatmul.mubr.bf16.gmra.mrb[80].mxu1 %v545_v54 }
 0x1c4   :  { %v1827_v61 = vpop.f32.mrb[0].mxu1 }
 0x1c5   :  { %v1828_v63 = vpop.f32.mrb[1].mxu1 }
 0x1c6   :  { %v1829_v2 = vadd.f32 %v1828_v63, %v1827_v61  ;;  %v1830_v4 = vpop.f32.mrb[2].mxu1 }
 0x1c7   :  { %v1891_v25 = vpop.f32.mrb[16].mxu0  ;;  %v1831_v17 = vpop.f32.mrb[3].mxu1 }
 0x1c8   :  { %v1229_v28 = vadd.f32 %v1829_v2, %v2947_v41  ;;  %v1832_v0 = vadd.f32 %v1831_v17, %v1830_v4  ;;  %v1892_v49 = vpop.f32.mrb[17].mxu0 }
 0x1c9   :  { %v1893_v23 = vadd.f32 %v1892_v49, %v1891_v25  ;;  %v1894_v57 = vpop.f32.mrb[18].mxu0 }
 0x1ca   :  { %v1232_v60 = vadd.f32 %v1832_v0, %v2947_v41  ;;  %v1895_v1 = vpop.f32.mrb[19].mxu0 }
 0x1cb   :  { %v2951_v19 = vadd.f32 %v1893_v23, %v1229_v28  ;;  %v1896_v48 = vadd.f32 %v1895_v1, %v1894_v57 }
 0x1cc   :  { %v1833_v58 = vpop.f32.mrb[4].mxu1 }
 0x1cd   :  { %v2953_v53 = vadd.f32 %v1896_v48, %v1232_v60  ;;  %v1834_v59 = vpop.f32.mrb[5].mxu1 }
 0x1ce   :  { %v1835_v62 = vadd.f32 %v1834_v59, %v1833_v58  ;;  %v1836_v31 = vpop.f32.mrb[6].mxu1 }
 0x1cf   :  { %v1897_v26 = vpop.f32.mrb[20].mxu0  ;;  %v1837_v47 = vpop.f32.mrb[7].mxu1 }
 0x1d0   :  { %v1237_v40 = vadd.f32 %v1835_v62, %v2947_v41  ;;  %v1838_v9 = vadd.f32 %v1837_v47, %v1836_v31  ;;  %v1898_v14 = vpop.f32.mrb[21].mxu0 }
 0x1d1   :  { %v1899_v34 = vadd.f32 %v1898_v14, %v1897_v26  ;;  %v1900_v12 = vpop.f32.mrb[22].mxu0 }
 0x1d2   :  { %v1240_v13 = vadd.f32 %v1838_v9, %v2947_v41  ;;  %v1901_v6 = vpop.f32.mrb[23].mxu0 }
 0x1d3   :  { %v2957_v11 = vadd.f32 %v1899_v34, %v1237_v40  ;;  %v1902_v22 = vadd.f32 %v1901_v6, %v1900_v12 }
 0x1d4   :  { %v1839_v42 = vpop.f32.mrb[8].mxu1 }
 0x1d5   :  { %v2959_v50 = vadd.f32 %v1902_v22, %v1240_v13  ;;  %v1840_v8 = vpop.f32.mrb[9].mxu1 }
 0x1d6   :  { %v1841_v39 = vadd.f32 %v1840_v8, %v1839_v42  ;;  %v1842_v45 = vpop.f32.mrb[10].mxu1 }
 0x1d7   :  { %v1903_v56 = vpop.f32.mrb[24].mxu0  ;;  %v1843_v16 = vpop.f32.mrb[11].mxu1 }
 0x1d8   :  { %v1245_v24 = vadd.f32 %v1841_v39, %v2947_v41  ;;  %v1844_v32 = vadd.f32 %v1843_v16, %v1842_v45  ;;  %v1904_v35 = vpop.f32.mrb[25].mxu0 }
 0x1d9   :  { %v1905_v21 = vadd.f32 %v1904_v35, %v1903_v56  ;;  %v1906_v46 = vpop.f32.mrb[26].mxu0 }
 0x1da   :  { %v1248_v52 = vadd.f32 %v1844_v32, %v2947_v41  ;;  %v1907_v15 = vpop.f32.mrb[27].mxu0 }
 0x1db   :  { %v2963_v18 = vadd.f32 %v1905_v21, %v1245_v24  ;;  %v1908_v27 = vadd.f32 %v1907_v15, %v1906_v46 }
 0x1dc   :  { %v1845_v29 = vpop.f32.mrb[12].mxu1 }
 0x1dd   :  { %v2965_v38 = vadd.f32 %v1908_v27, %v1248_v52  ;;  %v1846_v51 = vpop.f32.mrb[13].mxu1 }
 0x1de   :  { %v1847_v5 = vadd.f32 %v1846_v51, %v1845_v29  ;;  %v1848_v10 = vpop.f32.mrb[14].mxu1 }
 0x1df   :  { %v1909_v20 = vpop.f32.mrb[28].mxu0  ;;  %v1849_v30 = vpop.f32.mrb[15].mxu1 }
 0x1e0   :  { %v1253_v7 = vadd.f32 %v1847_v5, %v2947_v41  ;;  %v1850_v33 = vadd.f32 %v1849_v30, %v1848_v10  ;;  %v1910_v3 = vpop.f32.mrb[29].mxu0 }
 0x1e1   :  { %v1911_v36 = vadd.f32 %v1910_v3, %v1909_v20  ;;  %v1912_v55 = vpop.f32.mrb[30].mxu0 }
 0x1e2   :  { %v1256_v37 = vadd.f32 %v1850_v33, %v2947_v41  ;;  %v1913_v44 = vpop.f32.mrb[31].mxu0 }
 0x1e3   :  { %v2969_v43 = vadd.f32 %v1911_v36, %v1253_v7  ;;  %v1914_v54 = vadd.f32 %v1913_v44, %v1912_v55 }
 0x1e4   :  { %v1851_v61 = vpop.f32.mrb[16].mxu1 }
 0x1e5   :  { %v2971_v63 = vadd.f32 %v1914_v54, %v1256_v37  ;;  %v1852_v2 = vpop.f32.mrb[17].mxu1 }
 0x1e6   :  { %v1853_v4 = vadd.f32 %v1852_v2, %v1851_v61  ;;  %v1854_v25 = vpop.f32.mrb[18].mxu1 }
 0x1e7   :  { %v1915_v17 = vpop.f32.mrb[32].mxu0  ;;  %v1855_v28 = vpop.f32.mrb[19].mxu1 }
 0x1e8   :  { %v1261_v0 = vadd.f32 %v1853_v4, %v2947_v41  ;;  %v1856_v49 = vadd.f32 %v1855_v28, %v1854_v25  ;;  %v1916_v23 = vpop.f32.mrb[33].mxu0 }
 0x1e9   :  { %v1917_v57 = vadd.f32 %v1916_v23, %v1915_v17  ;;  %v1918_v60 = vpop.f32.mrb[34].mxu0 }
 0x1ea   :  { %v1264_v1 = vadd.f32 %v1856_v49, %v2947_v41  ;;  %v1919_v48 = vpop.f32.mrb[35].mxu0 }
 0x1eb   :  { %v2975_v58 = vadd.f32 %v1917_v57, %v1261_v0  ;;  %v1920_v59 = vadd.f32 %v1919_v48, %v1918_v60 }
 0x1ec   :  { %v1857_v62 = vpop.f32.mrb[20].mxu1 }
 0x1ed   :  { %v2977_v31 = vadd.f32 %v1920_v59, %v1264_v1  ;;  %v1858_v26 = vpop.f32.mrb[21].mxu1 }
 0x1ee   :  { %v1859_v47 = vadd.f32 %v1858_v26, %v1857_v62  ;;  %v1860_v40 = vpop.f32.mrb[22].mxu1 }
 0x1ef   :  { %v1921_v9 = vpop.f32.mrb[36].mxu0  ;;  %v1861_v14 = vpop.f32.mrb[23].mxu1 }
 0x1f0   :  { %v1269_v34 = vadd.f32 %v1859_v47, %v2947_v41  ;;  %v1862_v12 = vadd.f32 %v1861_v14, %v1860_v40  ;;  %v1922_v13 = vpop.f32.mrb[37].mxu0 }
 0x1f1   :  { %v1923_v6 = vadd.f32 %v1922_v13, %v1921_v9  ;;  %v1924_v22 = vpop.f32.mrb[38].mxu0 }
 0x1f2   :  { %v1272_v42 = vadd.f32 %v1862_v12, %v2947_v41  ;;  %v1925_v8 = vpop.f32.mrb[39].mxu0 }
 0x1f3   :  { %v2981_v39 = vadd.f32 %v1923_v6, %v1269_v34  ;;  %v1926_v45 = vadd.f32 %v1925_v8, %v1924_v22 }
 0x1f4   :  { %v1863_v56 = vpop.f32.mrb[24].mxu1 }
 0x1f5   :  { %v2983_v16 = vadd.f32 %v1926_v45, %v1272_v42  ;;  %v1864_v24 = vpop.f32.mrb[25].mxu1 }
 0x1f6   :  { %v1865_v32 = vadd.f32 %v1864_v24, %v1863_v56  ;;  %v1866_v35 = vpop.f32.mrb[26].mxu1 }
 0x1f7   :  { %v1927_v21 = vpop.f32.mrb[40].mxu0  ;;  %v1867_v46 = vpop.f32.mrb[27].mxu1 }
 0x1f8   :  { %v1277_v52 = vadd.f32 %v1865_v32, %v2947_v41  ;;  %v1868_v15 = vadd.f32 %v1867_v46, %v1866_v35  ;;  %v1928_v27 = vpop.f32.mrb[41].mxu0 }
 0x1f9   :  { %v1929_v29 = vadd.f32 %v1928_v27, %v1927_v21  ;;  %v1930_v51 = vpop.f32.mrb[42].mxu0 }
 0x1fa   :  { %v1280_v5 = vadd.f32 %v1868_v15, %v2947_v41  ;;  %v1931_v10 = vpop.f32.mrb[43].mxu0 }
 0x1fb   :  { %v2987_v20 = vadd.f32 %v1929_v29, %v1277_v52  ;;  %v1932_v30 = vadd.f32 %v1931_v10, %v1930_v51 }
 0x1fc   :  { %v1869_v7 = vpop.f32.mrb[28].mxu1 }
 0x1fd   :  { %v2989_v33 = vadd.f32 %v1932_v30, %v1280_v5  ;;  %v1870_v3 = vpop.f32.mrb[29].mxu1 }
 0x1fe   :  { %v1871_v36 = vadd.f32 %v1870_v3, %v1869_v7  ;;  %v1872_v55 = vpop.f32.mrb[30].mxu1 }
 0x1ff   :  { %v1933_v37 = vpop.f32.mrb[44].mxu0  ;;  %v1873_v44 = vpop.f32.mrb[31].mxu1 }
 0x200   :  { %v1285_v54 = vadd.f32 %v1871_v36, %v2947_v41  ;;  %v1874_v61 = vadd.f32 %v1873_v44, %v1872_v55  ;;  %v1934_v2 = vpop.f32.mrb[45].mxu0 }
 0x201   :  { %v1935_v4 = vadd.f32 %v1934_v2, %v1933_v37  ;;  %v1936_v25 = vpop.f32.mrb[46].mxu0 }
 0x202   :  { %v1288_v17 = vadd.f32 %v1874_v61, %v2947_v41  ;;  %v1937_v28 = vpop.f32.mrb[47].mxu0 }
 0x203   :  { %v2993_v0 = vadd.f32 %v1935_v4, %v1285_v54  ;;  %v1938_v49 = vadd.f32 %v1937_v28, %v1936_v25 }
 0x204   :  { %v1955_v23 = vpop.f32.mrb[32].mxu1 }
 0x205   :  { %v2995_v57 = vadd.f32 %v1938_v49, %v1288_v17  ;;  %v1956_v60 = vpop.f32.mrb[33].mxu1 }
 0x206   :  { %v1957_v1 = vadd.f32 %v1956_v60, %v1955_v23  ;;  %v1958_v48 = vpop.f32.mrb[34].mxu1 }
 0x207   :  { %v2019_v59 = vpop.f32.mrb[48].mxu0  ;;  %v1959_v62 = vpop.f32.mrb[35].mxu1 }
 0x208   :  { %v1423_v26 = vadd.f32 %v1957_v1, %v2951_v19  ;;  %v1960_v47 = vadd.f32 %v1959_v62, %v1958_v48  ;;  %v2020_v40 = vpop.f32.mrb[49].mxu0 }
 0x209   :  { %v2021_v9 = vadd.f32 %v2020_v40, %v2019_v59  ;;  %v2022_v14 = vpop.f32.mrb[50].mxu0 }
 0x20a   :  { %v1426_v41 = vadd.f32 %v1960_v47, %v2953_v53  ;;  %v2023_v34 = vpop.f32.mrb[51].mxu0 }
 0x20b   :  { %v2999_v12 = vadd.f32 %v2021_v9, %v1423_v26  ;;  %v2024_v13 = vadd.f32 %v2023_v34, %v2022_v14 }
 0x20c   :  { %v1961_v6 = vpop.f32.mrb[36].mxu1 }
 0x20d   :  { %v3001_v22 = vadd.f32 %v2024_v13, %v1426_v41  ;;  %v1962_v42 = vpop.f32.mrb[37].mxu1 }
 0x20e   :  { %v1963_v8 = vadd.f32 %v1962_v42, %v1961_v6  ;;  %v1964_v45 = vpop.f32.mrb[38].mxu1 }
 0x20f   :  { %v2025_v56 = vpop.f32.mrb[52].mxu0  ;;  %v1965_v24 = vpop.f32.mrb[39].mxu1 }
 0x210   :  { %v1431_v19 = vadd.f32 %v1963_v8, %v2957_v11  ;;  %v1966_v32 = vadd.f32 %v1965_v24, %v1964_v45  ;;  %v2026_v35 = vpop.f32.mrb[53].mxu0 }
 0x211   :  { %v2027_v21 = vadd.f32 %v2026_v35, %v2025_v56  ;;  %v2028_v46 = vpop.f32.mrb[54].mxu0 }
 0x212   :  { %v1434_v53 = vadd.f32 %v1966_v32, %v2959_v50  ;;  %v2029_v52 = vpop.f32.mrb[55].mxu0 }
 0x213   :  { %v3005_v15 = vadd.f32 %v2027_v21, %v1431_v19  ;;  %v2030_v27 = vadd.f32 %v2029_v52, %v2028_v46 }
 0x214   :  { %v1967_v29 = vpop.f32.mrb[40].mxu1 }
 0x215   :  { %v3007_v51 = vadd.f32 %v2030_v27, %v1434_v53  ;;  %v1968_v5 = vpop.f32.mrb[41].mxu1 }
 0x216   :  { %v1969_v10 = vadd.f32 %v1968_v5, %v1967_v29  ;;  %v1970_v30 = vpop.f32.mrb[42].mxu1 }
 0x217   :  { %v2031_v7 = vpop.f32.mrb[56].mxu0  ;;  %v1971_v3 = vpop.f32.mrb[43].mxu1 }
 0x218   :  { %v1439_v11 = vadd.f32 %v1969_v10, %v2963_v18  ;;  %v1972_v36 = vadd.f32 %v1971_v3, %v1970_v30  ;;  %v2032_v55 = vpop.f32.mrb[57].mxu0 }
 0x219   :  { %v2033_v37 = vadd.f32 %v2032_v55, %v2031_v7  ;;  %v2034_v44 = vpop.f32.mrb[58].mxu0 }
 0x21a   :  { %v1442_v50 = vadd.f32 %v1972_v36, %v2965_v38  ;;  %v2035_v54 = vpop.f32.mrb[59].mxu0 }
 0x21b   :  { %v3011_v61 = vadd.f32 %v2033_v37, %v1439_v11  ;;  %v2036_v2 = vadd.f32 %v2035_v54, %v2034_v44 }
 0x21c   :  { %v1973_v4 = vpop.f32.mrb[44].mxu1 }
 0x21d   :  { %v3013_v25 = vadd.f32 %v2036_v2, %v1442_v50  ;;  %v1974_v17 = vpop.f32.mrb[45].mxu1 }
 0x21e   :  { %v1975_v28 = vadd.f32 %v1974_v17, %v1973_v4  ;;  %v1976_v49 = vpop.f32.mrb[46].mxu1 }
 0x21f   :  { %v2037_v23 = vpop.f32.mrb[60].mxu0  ;;  %v1977_v60 = vpop.f32.mrb[47].mxu1 }
 0x220   :  { %v1447_v18 = vadd.f32 %v1975_v28, %v2969_v43  ;;  %v1978_v1 = vadd.f32 %v1977_v60, %v1976_v49  ;;  %v2038_v48 = vpop.f32.mrb[61].mxu0 }
 0x221   :  { %v2039_v59 = vadd.f32 %v2038_v48, %v2037_v23  ;;  %v2040_v62 = vpop.f32.mrb[62].mxu0 }
 0x222   :  { %v1450_v38 = vadd.f32 %v1978_v1, %v2971_v63  ;;  %v2041_v26 = vpop.f32.mrb[63].mxu0 }
 0x223   :  { %v3017_v47 = vadd.f32 %v2039_v59, %v1447_v18  ;;  %v2042_v40 = vadd.f32 %v2041_v26, %v2040_v62 }
 0x224   :  { %v1979_v9 = vpop.f32.mrb[48].mxu1 }
 0x225   :  { %v3019_v14 = vadd.f32 %v2042_v40, %v1450_v38  ;;  %v1980_v41 = vpop.f32.mrb[49].mxu1 }
 0x226   :  { %v1981_v34 = vadd.f32 %v1980_v41, %v1979_v9  ;;  %v1982_v13 = vpop.f32.mrb[50].mxu1 }
 0x227   :  { %v2043_v6 = vpop.f32.mrb[64].mxu0  ;;  %v1983_v42 = vpop.f32.mrb[51].mxu1 }
 0x228   :  { %v1455_v43 = vadd.f32 %v1981_v34, %v2975_v58  ;;  %v1984_v8 = vadd.f32 %v1983_v42, %v1982_v13  ;;  %v2044_v45 = vpop.f32.mrb[65].mxu0 }
 0x229   :  { %v2045_v56 = vadd.f32 %v2044_v45, %v2043_v6  ;;  %v2046_v24 = vpop.f32.mrb[66].mxu0 }
 0x22a   :  { %v1458_v63 = vadd.f32 %v1984_v8, %v2977_v31  ;;  %v2047_v19 = vpop.f32.mrb[67].mxu0 }
 0x22b   :  { %v3023_v32 = vadd.f32 %v2045_v56, %v1455_v43  ;;  %v2048_v35 = vadd.f32 %v2047_v19, %v2046_v24 }
 0x22c   :  { %v1985_v21 = vpop.f32.mrb[52].mxu1 }
 0x22d   :  { %v3025_v46 = vadd.f32 %v2048_v35, %v1458_v63  ;;  %v1986_v53 = vpop.f32.mrb[53].mxu1 }
 0x22e   :  { %v1987_v52 = vadd.f32 %v1986_v53, %v1985_v21  ;;  %v1988_v27 = vpop.f32.mrb[54].mxu1 }
 0x22f   :  { %v2049_v29 = vpop.f32.mrb[68].mxu0  ;;  %v1989_v5 = vpop.f32.mrb[55].mxu1 }
 0x230   :  { %v1463_v58 = vadd.f32 %v1987_v52, %v2981_v39  ;;  %v1990_v10 = vadd.f32 %v1989_v5, %v1988_v27  ;;  %v2050_v30 = vpop.f32.mrb[69].mxu0 }
 0x231   :  { %v2051_v7 = vadd.f32 %v2050_v30, %v2049_v29  ;;  %v2052_v3 = vpop.f32.mrb[70].mxu0 }
 0x232   :  { %v1466_v31 = vadd.f32 %v1990_v10, %v2983_v16  ;;  %v2053_v11 = vpop.f32.mrb[71].mxu0 }
 0x233   :  { %v3029_v36 = vadd.f32 %v2051_v7, %v1463_v58  ;;  %v2054_v55 = vadd.f32 %v2053_v11, %v2052_v3 }
 0x234   :  { %v1991_v37 = vpop.f32.mrb[56].mxu1 }
 0x235   :  { %v3031_v44 = vadd.f32 %v2054_v55, %v1466_v31  ;;  %v1992_v50 = vpop.f32.mrb[57].mxu1 }
 0x236   :  { %v1993_v54 = vadd.f32 %v1992_v50, %v1991_v37  ;;  %v1994_v2 = vpop.f32.mrb[58].mxu1 }
 0x237   :  { %v2055_v4 = vpop.f32.mrb[72].mxu0  ;;  %v1995_v17 = vpop.f32.mrb[59].mxu1 }
 0x238   :  { %v1471_v39 = vadd.f32 %v1993_v54, %v2987_v20  ;;  %v1996_v28 = vadd.f32 %v1995_v17, %v1994_v2  ;;  %v2056_v49 = vpop.f32.mrb[73].mxu0 }
 0x239   :  { %v2057_v23 = vadd.f32 %v2056_v49, %v2055_v4  ;;  %v2058_v60 = vpop.f32.mrb[74].mxu0 }
 0x23a   :  { %v1474_v16 = vadd.f32 %v1996_v28, %v2989_v33  ;;  %v2059_v18 = vpop.f32.mrb[75].mxu0 }
 0x23b   :  { %v3035_v1 = vadd.f32 %v2057_v23, %v1471_v39  ;;  %v2060_v48 = vadd.f32 %v2059_v18, %v2058_v60 }
 0x23c   :  { %v1997_v59 = vpop.f32.mrb[60].mxu1 }
 0x23d   :  { %v3037_v62 = vadd.f32 %v2060_v48, %v1474_v16  ;;  %v1998_v38 = vpop.f32.mrb[61].mxu1 }
 0x23e   :  { %v1999_v26 = vadd.f32 %v1998_v38, %v1997_v59  ;;  %v2000_v40 = vpop.f32.mrb[62].mxu1 }
 0x23f   :  { %v2061_v9 = vpop.f32.mrb[76].mxu0  ;;  %v2001_v41 = vpop.f32.mrb[63].mxu1 }
 0x240   :  { %v1479_v20 = vadd.f32 %v1999_v26, %v2993_v0  ;;  %v2002_v34 = vadd.f32 %v2001_v41, %v2000_v40  ;;  %v2062_v13 = vpop.f32.mrb[77].mxu0 }
 0x241   :  { %v2063_v6 = vadd.f32 %v2062_v13, %v2061_v9  ;;  %v2064_v42 = vpop.f32.mrb[78].mxu0 }
 0x242   :  { %v1482_v33 = vadd.f32 %v2002_v34, %v2995_v57  ;;  %v2065_v43 = vpop.f32.mrb[79].mxu0 }
 0x243   :  { %v3041_v8 = vadd.f32 %v2063_v6, %v1479_v20  ;;  %v2066_v45 = vadd.f32 %v2065_v43, %v2064_v42 }
 0x244   :  { %v2101_v56 = vpop.f32.mrb[64].mxu1 }
 0x245   :  { %v3043_v24 = vadd.f32 %v2066_v45, %v1482_v33  ;;  %v2102_v63 = vpop.f32.mrb[65].mxu1 }
 0x246   :  { %v2103_v19 = vadd.f32 %v2102_v63, %v2101_v56  ;;  %v2104_v35 = vpop.f32.mrb[66].mxu1 }
 0x247   :  { %v2083_v21 = vpop.f32.mrb[80].mxu0  ;;  %v2105_v53 = vpop.f32.mrb[67].mxu1 }
 0x248   :  { %v1641_v0 = vadd.f32 %v2103_v19, %v3017_v47  ;;  %v2084_v52 = vpop.f32.mrb[81].mxu0  ;;  %v2106_v27 = vadd.f32 %v2105_v53, %v2104_v35 }
 0x249   :  { %v2085_v29 = vadd.f32 %v2084_v52, %v2083_v21  ;;  %v2086_v5 = vpop.f32.mrb[82].mxu0 }
 0x24a   :  { %1685 = vst [vmem:[%s3115_s6 + $0x30] sm:$0xff] %v1641_v0  ;;  %v1644_v57 = vadd.f32 %v2106_v27, %v3019_v14  ;;  %v2087_v58 = vpop.f32.mrb[83].mxu0 }
 0x24b   :  { %v1617_v10 = vadd.f32 %v2085_v29, %v2999_v12  ;;  %v2088_v30 = vadd.f32 %v2087_v58, %v2086_v5 }
 0x24c   :  { %1686 = vst [vmem:[%s3115_s6 + $0x38] sm:$0xff] %v1644_v57  ;;  %v2107_v7 = vpop.f32.mrb[68].mxu1 }
 0x24d   :  { %1679 = vst [vmem:[%s3115_s6] sm:$0xff] %v1617_v10  ;;  %v1620_v47 = vadd.f32 %v2088_v30, %v3001_v22  ;;  %v2108_v3 = vpop.f32.mrb[69].mxu1 }
 0x24e   :  { %v2109_v31 = vadd.f32 %v2108_v3, %v2107_v7  ;;  %v2110_v11 = vpop.f32.mrb[70].mxu1 }
 0x24f   :  { %1680 = vst [vmem:[%s3115_s6 + $0x8] sm:$0xff] %v1620_v47  ;;  %v2089_v12 = vpop.f32.mrb[84].mxu0  ;;  %v2111_v14 = vpop.f32.mrb[71].mxu1 }
 0x250   :  { %v1649_v55 = vadd.f32 %v2109_v31, %v3023_v32  ;;  %v2090_v37 = vpop.f32.mrb[85].mxu0  ;;  %v2112_v50 = vadd.f32 %v2111_v14, %v2110_v11 }
 0x251   :  { %v2091_v54 = vadd.f32 %v2090_v37, %v2089_v12  ;;  %v2092_v2 = vpop.f32.mrb[86].mxu0 }
 0x252   :  { %1687 = vst [vmem:[%s3115_s6 + $0x40] sm:$0xff] %v1649_v55  ;;  %v1652_v22 = vadd.f32 %v2112_v50, %v3025_v46  ;;  %v2093_v4 = vpop.f32.mrb[87].mxu0 }
 0x253   :  { %v1625_v17 = vadd.f32 %v2091_v54, %v3005_v15  ;;  %v2094_v39 = vadd.f32 %v2093_v4, %v2092_v2 }
 0x254   :  { %1688 = vst [vmem:[%s3115_s6 + $0x48] sm:$0xff] %v1652_v22  ;;  %v2113_v28 = vpop.f32.mrb[72].mxu1 }
 0x255   :  { %1681 = vst [vmem:[%s3115_s6 + $0x10] sm:$0xff] %v1625_v17  ;;  %v1628_v32 = vadd.f32 %v2094_v39, %v3007_v51  ;;  %v2114_v49 = vpop.f32.mrb[73].mxu1 }
 0x256   :  { %v2115_v23 = vadd.f32 %v2114_v49, %v2113_v28  ;;  %v2116_v60 = vpop.f32.mrb[74].mxu1 }
 0x257   :  { %1682 = vst [vmem:[%s3115_s6 + $0x18] sm:$0xff] %v1628_v32  ;;  %v2095_v15 = vpop.f32.mrb[88].mxu0  ;;  %v2117_v46 = vpop.f32.mrb[75].mxu1 }
 0x258   :  { %v1657_v16 = vadd.f32 %v2115_v23, %v3029_v36  ;;  %v2096_v18 = vpop.f32.mrb[89].mxu0  ;;  %v2118_v48 = vadd.f32 %v2117_v46, %v2116_v60 }
 0x259   :  { %v2097_v59 = vadd.f32 %v2096_v18, %v2095_v15  ;;  %v2098_v38 = vpop.f32.mrb[90].mxu0 }
 0x25a   :  { %1689 = vst [vmem:[%s3115_s6 + $0x50] sm:$0xff] %v1657_v16  ;;  %v1660_v51 = vadd.f32 %v2118_v48, %v3031_v44  ;;  %v2099_v26 = vpop.f32.mrb[91].mxu0 }
 0x25b   :  { %v1633_v40 = vadd.f32 %v2097_v59, %v3011_v61  ;;  %v2100_v9 = vadd.f32 %v2099_v26, %v2098_v38 }
 0x25c   :  { %1690 = vst [vmem:[%s3115_s6 + $0x58] sm:$0xff] %v1660_v51  ;;  %v2119_v41 = vpop.f32.mrb[76].mxu1 }
 0x25d   :  { %1683 = vst [vmem:[%s3115_s6 + $0x20] sm:$0xff] %v1633_v40  ;;  %v1636_v36 = vadd.f32 %v2100_v9, %v3013_v25  ;;  %v2120_v20 = vpop.f32.mrb[77].mxu1 }
 0x25e   :  { %v2121_v34 = vadd.f32 %v2120_v20, %v2119_v41  ;;  %v2122_v13 = vpop.f32.mrb[78].mxu1 }
 0x25f   :  { %1684 = vst [vmem:[%s3115_s6 + $0x28] sm:$0xff] %v1636_v36  ;;  %v2123_v61 = vpop.f32.mrb[79].mxu1 }
 0x260   :  { %v1665_v44 = vadd.f32 %v2121_v34, %v3035_v1  ;;  %v2124_v6 = vadd.f32 %v2123_v61, %v2122_v13 }
 0x262   :  { %1691 = vst [vmem:[%s3115_s6 + $0x60] sm:$0xff] %v1665_v44  ;;  %v1668_v42 = vadd.f32 %v2124_v6, %v3037_v62 }
 0x264   :  { %1692 = vst [vmem:[%s3115_s6 + $0x68] sm:$0xff] %v1668_v42  ;;  %v2125_v25 = vpop.f32.mrb[80].mxu1 }
 0x265   :  { %v2126_v33 = vpop.f32.mrb[81].mxu1 }
 0x266   :  { %v2127_v43 = vadd.f32 %v2126_v33, %v2125_v25  ;;  %v2128_v45 = vpop.f32.mrb[82].mxu1 }
 0x267   :  { %v2129_v56 = vpop.f32.mrb[83].mxu1 }
 0x268   :  { %v1673_v63 = vadd.f32 %v2127_v43, %v3041_v8  ;;  %v2130_v19 = vadd.f32 %v2129_v56, %v2128_v45 }
 0x26a   :  { %1693 = vst [vmem:[%s3115_s6 + $0x70] sm:$0xff] %v1673_v63  ;;  %v1676_v1 = vadd.f32 %v2130_v19, %v3043_v24 }
 0x26c   :  { %1694 = vst [vmem:[%s3115_s6 + $0x78] sm:$0xff] %v1676_v1 }

</bundles_post_ra>
